<compile_context>
chip_gen: v5e
topology: v5e:2x2
jax: 0.10.0
libtpu: 0.0.40
codegen_flags: <defaults>
</compile_context>

<pallas_src>
import functools
import math

import jax
import jax.numpy as jnp
from jax.experimental import pallas as pl
from jax.experimental.pallas import tpu as pltpu

# ----- model hyper-parameters (module defaults) -------------------------------
H = 32                    # hidden_size
F = 64                    # expert_size
E = 16                    # num_experts
G = 4                     # num_expert_groups
EPG = E // G              # experts_per_group = 4
TOP_K = 4                 # experts_per_token
HC = H // 4               # confidence-estimator hidden width = 8
N_TOP_GROUPS = min(2, G)  # torch: top_groups_count

# expert-chunking of the in-kernel expert loop (bounds vreg live set)
EC = 4                    # experts per chunk
CL = EC * F               # 256 lanes per chunk
NCHUNK = E // EC          # 4 chunks


# ----------------------------- in-kernel math ---------------------------------
def _erf(x):
    # Abramowitz & Stegun 7.1.26, |err| < 1.5e-7 => matches torch's exact GELU.
    a1, a2, a3, a4, a5 = 0.254829592, -0.284496736, 1.421413741, -1.453152027, 1.061405429
    p = 0.3275911
    ax = jnp.abs(x)
    # divide -> EUP reciprocal (approx rel-err ~2^-12, below MXU default noise)
    t = pl.reciprocal(1.0 + p * ax, approx=True)
    poly = ((((a5 * t + a4) * t + a3) * t + a2) * t + a1) * t
    y = 1.0 - poly * jnp.exp(-ax * ax)
    return jnp.where(x >= 0.0, y, -y)


def _gelu(x):
    return 0.5 * x * (1.0 + _erf(x * 0.7071067811865476))


def _full(shape):
    """Constant-index BlockSpec: whole array VMEM-resident, DMA'd once."""
    zeros = (0,) * len(shape)
    return pl.BlockSpec(shape, lambda i, _z=zeros: _z)


# ------------------------------ fused MoE kernel ------------------------------
def moe_kernel(x_ref,
               wg_ref, bg_ref,            # group router at expert width [H,E],[1,E]
               we_ref, be_ref,            # expert routers, priority folded [H,E],[1,E]
               wc1_ref, bc1_ref, wc2_ref, bc2_ref,   # confidence MLP
               gmask_ref,                 # [E,E] block-diagonal group mask
               b2_ref,                    # [E,H] expert second-layer biases
               w1_ref, b1_ref, sel_ref, w2_ref,      # chunked expert weights
               o_ref):
    x = x_ref[...]                                   # [TN, H]

    # ---------------- hierarchical gating ----------------
    # Group-router softmax computed directly at expert lane width: each group's
    # logit is repeated EPG x (columns duplicated at init), so the true group
    # softmax denominator is sum(lanes)/EPG.
    gl = jnp.dot(x, wg_ref[...], preferred_element_type=jnp.float32) + bg_ref[...]
    gl = gl - jnp.max(gl, axis=-1, keepdims=True)
    ge = jnp.exp(gl)
    gp = ge * (float(EPG) / jnp.sum(ge, axis=-1, keepdims=True))   # [TN,E] group prob per lane

    # Top-2 groups kept value-in-place (torch keeps top_group_probs as weights).
    # Lanes within one group are bit-identical (same weight columns), so a
    # row-max equality selects the whole winning group at once.
    gw = jnp.zeros_like(gp)
    rem = gp
    for _ in range(N_TOP_GROUPS):
        m = jnp.max(rem, axis=-1, keepdims=True)
        hit = rem == m
        gw = jnp.where(hit, rem, gw)
        rem = jnp.where(hit, -1.0, rem)

    # Confidence estimator: Linear -> GELU -> Linear(->1) -> Sigmoid
    hc = _gelu(jnp.dot(x, wc1_ref[...], preferred_element_type=jnp.float32) + bc1_ref[...])
    c = jax.nn.sigmoid(jnp.sum(hc * wc2_ref[...], axis=-1, keepdims=True) + bc2_ref[...])  # [TN,1]

    # Per-group expert softmax (priority already folded into we/be at init).
    el = jnp.dot(x, we_ref[...], preferred_element_type=jnp.float32) + be_ref[...]
    el = el - jnp.max(el, axis=-1, keepdims=True)        # softmax-invariant per group
    ee = jnp.exp(el)
    den = jnp.dot(ee, gmask_ref[...], preferred_element_type=jnp.float32)   # per-group sums
    pgrp = ee / den
    # confidence mixing with the in-group uniform 1/EPG (torch: /experts_per_group)
    ep = pgrp * c + (1.0 - c) * (1.0 / EPG)

    # Hierarchical scores.  TOP_K == EPG, so the within-group top-k is identity.
    # TODO(synk): general within-group top-k only needed if experts_per_token < experts_per_group.
    scores = ep * gw
    scores = scores / (jnp.sum(scores, axis=-1, keepdims=True) + 1e-9)

    # Global top-k -> dispatch/combine tensor (values kept in place; first-lane
    # tie-break like torch.topk, implemented with iota + lane-min).
    lanes = jax.lax.broadcasted_iota(jnp.int32, scores.shape, 1).astype(jnp.float32)
    d = jnp.zeros_like(scores)
    rem = scores
    for _ in range(TOP_K):
        m = jnp.max(rem, axis=-1, keepdims=True)
        cand = jnp.where(rem == m, lanes, 1e9)
        hit = lanes == jnp.min(cand, axis=-1, keepdims=True)
        d = jnp.where(hit, rem, d)
        rem = jnp.where(hit, -1.0, rem)

    # ---------------- experts (dense, dispatch-weighted combine) ----------------
    # TODO(synk): only TOP_K of E experts are live per token (4x dense over-compute);
    # for large N switch to scalar-prefetch token grouping (megablox-style).
    y0 = jnp.dot(d, b2_ref[...], preferred_element_type=jnp.float32)        # [TN,H]

    def chunk(cidx, y):
        # chunk of EC experts = CL lanes; keeps live intermediates small
        h = _gelu(jnp.dot(x, w1_ref[cidx], preferred_element_type=jnp.float32)
                  + b1_ref[cidx])                                            # [TN,CL]
        dsc = jnp.dot(d, sel_ref[cidx], preferred_element_type=jnp.float32)  # [TN,CL]
        return y + jnp.dot(h * dsc, w2_ref[cidx],
                           preferred_element_type=jnp.float32)               # [TN,H]

    y = jax.lax.fori_loop(0, NCHUNK, chunk, y0, unroll=True)
    o_ref[...] = y.astype(o_ref.dtype)


# ------------------------------ wrapper ---------------------------------------
def _pick_tile(n, tn):
    """Token tile: multiple of 8, <= tn; prefer >=2 grid steps (v7x megacore)."""
    np8 = ((n + 7) // 8) * 8
    t = max(8, min((tn // 8) * 8, np8))
    if np8 <= t and np8 >= 16:
        t = max(8, ((np8 // 2 + 7) // 8) * 8)
    return t


def enhanced_moe_forward(x, params, tn=128):
    b, s, _ = x.shape
    n = b * s
    x_flat = x.reshape(n, H).astype(jnp.float32)

    tn_eff = _pick_tile(n, tn)
    n_pad = pl.cdiv(n, tn_eff) * tn_eff
    if n_pad != n:
        x_flat = jnp.pad(x_flat, ((0, n_pad - n), (0, 0)))

    out_flat = pl.pallas_call(
        moe_kernel,
        out_shape=jax.ShapeDtypeStruct((n_pad, H), jnp.float32),
        grid_spec=pltpu.PrefetchScalarGridSpec(
            num_scalar_prefetch=0,
            grid=(n_pad // tn_eff,),
            in_specs=[pl.BlockSpec((tn_eff, H), lambda i: (i, 0)),
                      _full((H, E)), _full((1, E)),
                      _full((H, E)), _full((1, E)),
                      _full((H, HC)), _full((1, HC)),
                      _full((1, HC)), _full((1, 1)),
                      _full((E, E)),
                      _full((E, H)),
                      _full((NCHUNK, H, CL)), _full((NCHUNK, 1, CL)),
                      _full((NCHUNK, E, CL)), _full((NCHUNK, CL, H))],
            out_specs=pl.BlockSpec((tn_eff, H), lambda i: (i, 0))),
        compiler_params=pltpu.CompilerParams(
            dimension_semantics=("parallel",),
            # weights ~0.35 MiB total; well under the 64 MiB v7x VMEM ceiling
            # even double-buffered.  Re-derive if H/F/E grow.
            vmem_limit_bytes=32 * 1024 * 1024),
    )(x_flat,
      params["wg16"], params["bg16"],
      params["we_p"], params["be_p"],
      params["wc1"], params["bc1"], params["wc2_row"], params["bc2"],
      params["group_mask"], params["b2_mat"],
      params["w1_c"], params["b1_c"], params["sel_c"], params["w2_c"])

    # TODO(synk): training-only aux load-balancing loss / usage buffers /
    # router jitter / expert dropout omitted (eval mode => aux_loss == 0).
    aux_loss = jnp.float32(0.0)
    return out_flat[:n].reshape(b, s, H), aux_loss


# ------------------------------- param init -----------------------------------
def init_params(key):
    def lin(k, din, dout):
        bound = 1.0 / math.sqrt(din)
        kw, kb = jax.random.split(k)
        w = jax.random.uniform(kw, (din, dout), jnp.float32, -bound, bound)
        b = jax.random.uniform(kb, (dout,), jnp.float32, -bound, bound)
        return w, b

    ks = jax.random.split(key, 6)

    # group router, broadcast to expert-lane width (each column repeated EPG x)
    wg, bg = lin(ks[0], H, G)
    wg16 = jnp.repeat(wg, EPG, axis=1)                      # [H, E]
    bg16 = jnp.repeat(bg, EPG)[None, :]                     # [1, E]

    # per-group expert routers, concatenated; priority folded into weights/bias
    we_cols, be_cols = [], []
    for g in range(G):
        w, b = lin(jax.random.fold_in(ks[1], g), H, EPG)
        we_cols.append(w)
        be_cols.append(b)
    we_flat = jnp.concatenate(we_cols, axis=1)              # [H, E]
    be_flat = jnp.concatenate(be_cols)[None, :]             # [1, E]
    prio = jnp.ones((E,), jnp.float32).at[::EPG].set(1.2)[None, :]
    we_p = we_flat * prio
    be_p = be_flat * prio

    # confidence estimator
    wc1, bc1 = lin(ks[2], H, HC)
    wc2, bc2 = lin(ks[3], HC, 1)

    # experts
    w1c, b1c, w2c, b2c = [], [], [], []
    for e in range(E):
        w, b = lin(jax.random.fold_in(ks[4], e), H, F)
        w1c.append(w)
        b1c.append(b)
        w, b = lin(jax.random.fold_in(ks[5], e), F, H)
        w2c.append(w)
        b2c.append(b)
    w1_flat = jnp.concatenate(w1c, axis=1)                  # [H, E*F]
    b1_flat = jnp.concatenate(b1c)[None, :]                 # [1, E*F]
    w2_flat = jnp.concatenate(w2c, axis=0)                  # [E*F, H]
    b2_mat = jnp.stack(b2c)                                 # [E, H]

    # expert -> lane-block selection matrix and block-diagonal group mask
    sel = jnp.repeat(jnp.eye(E, dtype=jnp.float32), F, axis=1)            # [E, E*F]
    group_mask = jnp.kron(jnp.eye(G, dtype=jnp.float32),
                          jnp.ones((EPG, EPG), jnp.float32))              # [E, E]

    # chunk the expert weights along a leading dim (dynamic indexing in-kernel)
    w1_c = w1_flat.reshape(H, NCHUNK, CL).transpose(1, 0, 2)              # [NC, H, CL]
    b1_c = b1_flat.reshape(NCHUNK, CL)[:, None, :]                        # [NC, 1, CL]
    w2_c = w2_flat.reshape(NCHUNK, CL, H)                                 # [NC, CL, H]
    sel_c = sel.reshape(E, NCHUNK, CL).transpose(1, 0, 2)                 # [NC, E, CL]

    return dict(wg16=wg16, bg16=bg16, we_p=we_p, be_p=be_p,
                wc1=wc1, bc1=bc1[None, :], wc2_row=wc2.T, bc2=bc2[None, :],
                group_mask=group_mask, b2_mat=b2_mat,
                w1_c=w1_c, b1_c=b1_c, sel_c=sel_c, w2_c=w2_c)


# ---------------------------------- main ---------------------------------------
if __name__ == "__main__":
    key = jax.random.PRNGKey(0)
    pkey, xkey = jax.random.split(key)
    params = init_params(pkey)

    B, S = 2, 8
    x = jax.random.normal(xkey, (B, S, H), jnp.float32)

    fwd = jax.jit(functools.partial(enhanced_moe_forward, tn=128))
    out, aux_loss = fwd(x, params)
    jax.block_until_ready((out, aux_loss))

    assert out.shape == (B, S, H)
    assert out.dtype == jnp.float32
    assert bool(jnp.all(jnp.isfinite(out)))
    print("KERNEL_OK")
</pallas_src>

<mosaic_0001>
module attributes {stable_mosaic.version = 11 : i64} {
  func.func @moe_kernel(%arg0: i32, %arg1: memref<8x32xf32, #tpu.memory_space<vmem>>, %arg2: memref<32x16xf32, #tpu.memory_space<vmem>>, %arg3: memref<1x16xf32, #tpu.memory_space<vmem>>, %arg4: memref<32x16xf32, #tpu.memory_space<vmem>>, %arg5: memref<1x16xf32, #tpu.memory_space<vmem>>, %arg6: memref<32x8xf32, #tpu.memory_space<vmem>>, %arg7: memref<1x8xf32, #tpu.memory_space<vmem>>, %arg8: memref<1x8xf32, #tpu.memory_space<vmem>>, %arg9: memref<1x1xf32, #tpu.memory_space<vmem>>, %arg10: memref<16x16xf32, #tpu.memory_space<vmem>>, %arg11: memref<16x32xf32, #tpu.memory_space<vmem>>, %arg12: memref<4x32x256xf32, #tpu.memory_space<vmem>>, %arg13: memref<4x1x256xf32, #tpu.memory_space<vmem>>, %arg14: memref<4x16x256xf32, #tpu.memory_space<vmem>>, %arg15: memref<4x256x32xf32, #tpu.memory_space<vmem>>, %arg16: memref<8x32xf32, #tpu.memory_space<vmem>>) attributes {dimension_semantics = [#tpu.dimension_semantics<parallel>], iteration_bounds = array<i64: 2>, scalar_prefetch = 0 : i64, scratch_operands = 0 : i64, tpu.core_type = #tpu.core_type<tc>, window_params = [{transform_indices = @transform_0, window_bounds = array<i64: 8, 32>}, {pipeline_mode = #tpu.pipeline_mode<synchronous>, transform_indices = @transform_1, window_bounds = array<i64: 32, 16>}, {pipeline_mode = #tpu.pipeline_mode<synchronous>, transform_indices = @transform_2, window_bounds = array<i64: 1, 16>}, {pipeline_mode = #tpu.pipeline_mode<synchronous>, transform_indices = @transform_3, window_bounds = array<i64: 32, 16>}, {pipeline_mode = #tpu.pipeline_mode<synchronous>, transform_indices = @transform_4, window_bounds = array<i64: 1, 16>}, {pipeline_mode = #tpu.pipeline_mode<synchronous>, transform_indices = @transform_5, window_bounds = array<i64: 32, 8>}, {pipeline_mode = #tpu.pipeline_mode<synchronous>, transform_indices = @transform_6, window_bounds = array<i64: 1, 8>}, {pipeline_mode = #tpu.pipeline_mode<synchronous>, transform_indices = @transform_7, window_bounds = array<i64: 1, 8>}, {pipeline_mode = #tpu.pipeline_mode<synchronous>, transform_indices = @transform_8, window_bounds = array<i64: 1, 1>}, {pipeline_mode = #tpu.pipeline_mode<synchronous>, transform_indices = @transform_9, window_bounds = array<i64: 16, 16>}, {pipeline_mode = #tpu.pipeline_mode<synchronous>, transform_indices = @transform_10, window_bounds = array<i64: 16, 32>}, {pipeline_mode = #tpu.pipeline_mode<synchronous>, transform_indices = @transform_11, window_bounds = array<i64: 4, 32, 256>}, {pipeline_mode = #tpu.pipeline_mode<synchronous>, transform_indices = @transform_12, window_bounds = array<i64: 4, 1, 256>}, {pipeline_mode = #tpu.pipeline_mode<synchronous>, transform_indices = @transform_13, window_bounds = array<i64: 4, 16, 256>}, {pipeline_mode = #tpu.pipeline_mode<synchronous>, transform_indices = @transform_14, window_bounds = array<i64: 4, 256, 32>}, {transform_indices = @transform_15, window_bounds = array<i64: 8, 32>}]} {
    %c0 = arith.constant 0 : index
    %c0_0 = arith.constant 0 : index
    %0 = vector.load %arg1[%c0, %c0_0] : memref<8x32xf32, #tpu.memory_space<vmem>>, vector<8x32xf32>
    %c0_1 = arith.constant 0 : index
    %c0_2 = arith.constant 0 : index
    %1 = vector.load %arg2[%c0_1, %c0_2] : memref<32x16xf32, #tpu.memory_space<vmem>>, vector<32x16xf32>
    %cst = arith.constant dense<0.000000e+00> : vector<8x16xf32>
    %2 = tpu.matmul %0, %1, %cst {dimension_numbers = #tpu.dot_dimension_numbers<[1], [0], [0], [1], [0, 0, 1, 1], [], []>} : vector<8x32xf32>, vector<32x16xf32>, vector<8x16xf32> -> vector<8x16xf32>
    %c0_3 = arith.constant 0 : index
    %c0_4 = arith.constant 0 : index
    %3 = vector.load %arg3[%c0_3, %c0_4] : memref<1x16xf32, #tpu.memory_space<vmem>>, vector<1x16xf32>
    %4 = vector.broadcast %3 : vector<1x16xf32> to vector<8x16xf32>
    %5 = arith.addf %2, %4 : vector<8x16xf32>
    %cst_5 = arith.constant dense<0xFF800000> : vector<8xf32>
    %6 = vector.multi_reduction <maximumf>, %5, %cst_5 [1] : vector<8x16xf32> to vector<8xf32>
    %7 = vector.shape_cast %6 : vector<8xf32> to vector<8x1xf32>
    %8 = vector.broadcast %7 : vector<8x1xf32> to vector<8x16xf32>
    %9 = arith.subf %5, %8 : vector<8x16xf32>
    %10 = math.exp %9 : vector<8x16xf32>
    %cst_6 = arith.constant dense<0.000000e+00> : vector<8xf32>
    %11 = vector.multi_reduction <add>, %10, %cst_6 [1] : vector<8x16xf32> to vector<8xf32>
    %12 = vector.shape_cast %11 : vector<8xf32> to vector<8x1xf32>
    %cst_7 = arith.constant 4.000000e+00 : f32
    %13 = vector.broadcast %cst_7 : f32 to vector<8x1xf32>
    %14 = arith.divf %13, %12 : vector<8x1xf32>
    %15 = vector.broadcast %14 : vector<8x1xf32> to vector<8x16xf32>
    %16 = arith.mulf %10, %15 : vector<8x16xf32>
    %cst_8 = arith.constant 0.000000e+00 : f32
    %17 = vector.broadcast %cst_8 : f32 to vector<8x16xf32>
    %cst_9 = arith.constant dense<0xFF800000> : vector<8xf32>
    %18 = vector.multi_reduction <maximumf>, %16, %cst_9 [1] : vector<8x16xf32> to vector<8xf32>
    %19 = vector.shape_cast %18 : vector<8xf32> to vector<8x1xf32>
    %20 = vector.broadcast %19 : vector<8x1xf32> to vector<8x16xf32>
    %21 = arith.cmpf oeq, %16, %20 : vector<8x16xf32>
    %22 = arith.select %21, %16, %17 : vector<8x16xi1>, vector<8x16xf32>
    %cst_10 = arith.constant -1.000000e+00 : f32
    %23 = vector.broadcast %cst_10 : f32 to vector<8x16xf32>
    %24 = arith.select %21, %23, %16 : vector<8x16xi1>, vector<8x16xf32>
    %cst_11 = arith.constant dense<0xFF800000> : vector<8xf32>
    %25 = vector.multi_reduction <maximumf>, %24, %cst_11 [1] : vector<8x16xf32> to vector<8xf32>
    %26 = vector.shape_cast %25 : vector<8xf32> to vector<8x1xf32>
    %27 = vector.broadcast %26 : vector<8x1xf32> to vector<8x16xf32>
    %28 = arith.cmpf oeq, %24, %27 : vector<8x16xf32>
    %29 = arith.select %28, %24, %22 : vector<8x16xi1>, vector<8x16xf32>
    %c0_12 = arith.constant 0 : index
    %c0_13 = arith.constant 0 : index
    %30 = vector.load %arg6[%c0_12, %c0_13] : memref<32x8xf32, #tpu.memory_space<vmem>>, vector<32x8xf32>
    %cst_14 = arith.constant dense<0.000000e+00> : vector<8x8xf32>
    %31 = tpu.matmul %0, %30, %cst_14 {dimension_numbers = #tpu.dot_dimension_numbers<[1], [0], [0], [1], [0, 0, 1, 1], [], []>} : vector<8x32xf32>, vector<32x8xf32>, vector<8x8xf32> -> vector<8x8xf32>
    %c0_15 = arith.constant 0 : index
    %c0_16 = arith.constant 0 : index
    %32 = vector.load %arg7[%c0_15, %c0_16] : memref<1x8xf32, #tpu.memory_space<vmem>>, vector<1x8xf32>
    %33 = vector.broadcast %32 : vector<1x8xf32> to vector<8x8xf32>
    %34 = arith.addf %31, %33 : vector<8x8xf32>
    %cst_17 = arith.constant 5.000000e-01 : f32
    %35 = vector.broadcast %cst_17 : f32 to vector<8x8xf32>
    %36 = arith.mulf %35, %34 : vector<8x8xf32>
    %cst_18 = arith.constant 0.707106769 : f32
    %37 = vector.broadcast %cst_18 : f32 to vector<8x8xf32>
    %38 = arith.mulf %34, %37 : vector<8x8xf32>
    %39 = math.absf %38 : vector<8x8xf32>
    %cst_19 = arith.constant 0.327591091 : f32
    %40 = vector.broadcast %cst_19 : f32 to vector<8x8xf32>
    %41 = arith.mulf %40, %39 : vector<8x8xf32>
    %cst_20 = arith.constant 1.000000e+00 : f32
    %42 = vector.broadcast %cst_20 : f32 to vector<8x8xf32>
    %43 = arith.addf %42, %41 : vector<8x8xf32>
    %44 = tpu.reciprocal %43 {approx = true} : vector<8x8xf32> -> vector<8x8xf32>
    %cst_21 = arith.constant 1.06140542 : f32
    %45 = vector.broadcast %cst_21 : f32 to vector<8x8xf32>
    %46 = arith.mulf %45, %44 : vector<8x8xf32>
    %cst_22 = arith.constant -1.45315206 : f32
    %47 = vector.broadcast %cst_22 : f32 to vector<8x8xf32>
    %48 = arith.addf %46, %47 : vector<8x8xf32>
    %49 = arith.mulf %48, %44 : vector<8x8xf32>
    %cst_23 = arith.constant 1.42141378 : f32
    %50 = vector.broadcast %cst_23 : f32 to vector<8x8xf32>
    %51 = arith.addf %49, %50 : vector<8x8xf32>
    %52 = arith.mulf %51, %44 : vector<8x8xf32>
    %cst_24 = arith.constant -0.284496725 : f32
    %53 = vector.broadcast %cst_24 : f32 to vector<8x8xf32>
    %54 = arith.addf %52, %53 : vector<8x8xf32>
    %55 = arith.mulf %54, %44 : vector<8x8xf32>
    %cst_25 = arith.constant 0.254829586 : f32
    %56 = vector.broadcast %cst_25 : f32 to vector<8x8xf32>
    %57 = arith.addf %55, %56 : vector<8x8xf32>
    %58 = arith.mulf %57, %44 : vector<8x8xf32>
    %cst_26 = arith.constant 0.000000e+00 : f32
    %59 = vector.broadcast %cst_26 : f32 to vector<8x8xf32>
    %60 = arith.subf %59, %39 : vector<8x8xf32>
    %61 = arith.mulf %60, %39 : vector<8x8xf32>
    %62 = math.exp %61 : vector<8x8xf32>
    %63 = arith.mulf %58, %62 : vector<8x8xf32>
    %cst_27 = arith.constant 1.000000e+00 : f32
    %64 = vector.broadcast %cst_27 : f32 to vector<8x8xf32>
    %65 = arith.subf %64, %63 : vector<8x8xf32>
    %cst_28 = arith.constant 0.000000e+00 : f32
    %66 = vector.broadcast %cst_28 : f32 to vector<8x8xf32>
    %67 = arith.cmpf oge, %38, %66 : vector<8x8xf32>
    %cst_29 = arith.constant 0.000000e+00 : f32
    %68 = vector.broadcast %cst_29 : f32 to vector<8x8xf32>
    %69 = arith.subf %68, %65 : vector<8x8xf32>
    %70 = arith.select %67, %65, %69 : vector<8x8xi1>, vector<8x8xf32>
    %cst_30 = arith.constant 1.000000e+00 : f32
    %71 = vector.broadcast %cst_30 : f32 to vector<8x8xf32>
    %72 = arith.addf %71, %70 : vector<8x8xf32>
    %73 = arith.mulf %36, %72 : vector<8x8xf32>
    %c0_31 = arith.constant 0 : index
    %c0_32 = arith.constant 0 : index
    %74 = vector.load %arg8[%c0_31, %c0_32] : memref<1x8xf32, #tpu.memory_space<vmem>>, vector<1x8xf32>
    %75 = vector.broadcast %74 : vector<1x8xf32> to vector<8x8xf32>
    %76 = arith.mulf %73, %75 : vector<8x8xf32>
    %cst_33 = arith.constant dense<0.000000e+00> : vector<8xf32>
    %77 = vector.multi_reduction <add>, %76, %cst_33 [1] : vector<8x8xf32> to vector<8xf32>
    %78 = vector.shape_cast %77 : vector<8xf32> to vector<8x1xf32>
    %c0_34 = arith.constant 0 : index
    %c0_35 = arith.constant 0 : index
    %79 = vector.load %arg9[%c0_34, %c0_35] : memref<1x1xf32, #tpu.memory_space<vmem>>, vector<1x1xf32>
    %80 = vector.broadcast %79 : vector<1x1xf32> to vector<8x1xf32>
    %81 = arith.addf %78, %80 : vector<8x1xf32>
    %82 = arith.negf %81 : vector<8x1xf32>
    %83 = math.exp %82 : vector<8x1xf32>
    %cst_36 = arith.constant 1.000000e+00 : f32
    %84 = vector.broadcast %cst_36 : f32 to vector<8x1xf32>
    %85 = arith.addf %84, %83 : vector<8x1xf32>
    %86 = arith.divf %84, %85 : vector<8x1xf32>
    %c0_37 = arith.constant 0 : index
    %c0_38 = arith.constant 0 : index
    %87 = vector.load %arg4[%c0_37, %c0_38] : memref<32x16xf32, #tpu.memory_space<vmem>>, vector<32x16xf32>
    %cst_39 = arith.constant dense<0.000000e+00> : vector<8x16xf32>
    %88 = tpu.matmul %0, %87, %cst_39 {dimension_numbers = #tpu.dot_dimension_numbers<[1], [0], [0], [1], [0, 0, 1, 1], [], []>} : vector<8x32xf32>, vector<32x16xf32>, vector<8x16xf32> -> vector<8x16xf32>
    %c0_40 = arith.constant 0 : index
    %c0_41 = arith.constant 0 : index
    %89 = vector.load %arg5[%c0_40, %c0_41] : memref<1x16xf32, #tpu.memory_space<vmem>>, vector<1x16xf32>
    %90 = vector.broadcast %89 : vector<1x16xf32> to vector<8x16xf32>
    %91 = arith.addf %88, %90 : vector<8x16xf32>
    %cst_42 = arith.constant dense<0xFF800000> : vector<8xf32>
    %92 = vector.multi_reduction <maximumf>, %91, %cst_42 [1] : vector<8x16xf32> to vector<8xf32>
    %93 = vector.shape_cast %92 : vector<8xf32> to vector<8x1xf32>
    %94 = vector.broadcast %93 : vector<8x1xf32> to vector<8x16xf32>
    %95 = arith.subf %91, %94 : vector<8x16xf32>
    %96 = math.exp %95 : vector<8x16xf32>
    %c0_43 = arith.constant 0 : index
    %c0_44 = arith.constant 0 : index
    %97 = vector.load %arg10[%c0_43, %c0_44] : memref<16x16xf32, #tpu.memory_space<vmem>>, vector<16x16xf32>
    %cst_45 = arith.constant dense<0.000000e+00> : vector<8x16xf32>
    %98 = tpu.matmul %96, %97, %cst_45 {dimension_numbers = #tpu.dot_dimension_numbers<[1], [0], [0], [1], [0, 0, 1, 1], [], []>} : vector<8x16xf32>, vector<16x16xf32>, vector<8x16xf32> -> vector<8x16xf32>
    %99 = arith.divf %96, %98 : vector<8x16xf32>
    %100 = vector.broadcast %86 : vector<8x1xf32> to vector<8x16xf32>
    %101 = arith.mulf %99, %100 : vector<8x16xf32>
    %cst_46 = arith.constant 1.000000e+00 : f32
    %102 = vector.broadcast %cst_46 : f32 to vector<8x1xf32>
    %103 = arith.subf %102, %86 : vector<8x1xf32>
    %cst_47 = arith.constant 2.500000e-01 : f32
    %104 = vector.broadcast %cst_47 : f32 to vector<8x1xf32>
    %105 = arith.mulf %103, %104 : vector<8x1xf32>
    %106 = vector.broadcast %105 : vector<8x1xf32> to vector<8x16xf32>
    %107 = arith.addf %101, %106 : vector<8x16xf32>
    %108 = arith.mulf %107, %29 : vector<8x16xf32>
    %cst_48 = arith.constant dense<0.000000e+00> : vector<8xf32>
    %109 = vector.multi_reduction <add>, %108, %cst_48 [1] : vector<8x16xf32> to vector<8xf32>
    %110 = vector.shape_cast %109 : vector<8xf32> to vector<8x1xf32>
    %cst_49 = arith.constant 9.99999971E-10 : f32
    %111 = vector.broadcast %cst_49 : f32 to vector<8x1xf32>
    %112 = arith.addf %110, %111 : vector<8x1xf32>
    %113 = vector.broadcast %112 : vector<8x1xf32> to vector<8x16xf32>
    %114 = arith.divf %108, %113 : vector<8x16xf32>
    %115 = tpu.iota {dimensions = array<i32: 1>} : vector<8x16xi32>
    %116 = arith.sitofp %115 : vector<8x16xi32> to vector<8x16xf32>
    %cst_50 = arith.constant 0.000000e+00 : f32
    %117 = vector.broadcast %cst_50 : f32 to vector<8x16xf32>
    %cst_51 = arith.constant dense<0xFF800000> : vector<8xf32>
    %118 = vector.multi_reduction <maximumf>, %114, %cst_51 [1] : vector<8x16xf32> to vector<8xf32>
    %119 = vector.shape_cast %118 : vector<8xf32> to vector<8x1xf32>
    %120 = vector.broadcast %119 : vector<8x1xf32> to vector<8x16xf32>
    %121 = arith.cmpf oeq, %114, %120 : vector<8x16xf32>
    %cst_52 = arith.constant 1.000000e+09 : f32
    %122 = vector.broadcast %cst_52 : f32 to vector<8x16xf32>
    %123 = arith.select %121, %116, %122 : vector<8x16xi1>, vector<8x16xf32>
    %cst_53 = arith.constant dense<0x7F800000> : vector<8xf32>
    %124 = vector.multi_reduction <minimumf>, %123, %cst_53 [1] : vector<8x16xf32> to vector<8xf32>
    %125 = vector.shape_cast %124 : vector<8xf32> to vector<8x1xf32>
    %126 = vector.broadcast %125 : vector<8x1xf32> to vector<8x16xf32>
    %127 = arith.cmpf oeq, %116, %126 : vector<8x16xf32>
    %128 = arith.select %127, %114, %117 : vector<8x16xi1>, vector<8x16xf32>
    %cst_54 = arith.constant -1.000000e+00 : f32
    %129 = vector.broadcast %cst_54 : f32 to vector<8x16xf32>
    %130 = arith.select %127, %129, %114 : vector<8x16xi1>, vector<8x16xf32>
    %cst_55 = arith.constant dense<0xFF800000> : vector<8xf32>
    %131 = vector.multi_reduction <maximumf>, %130, %cst_55 [1] : vector<8x16xf32> to vector<8xf32>
    %132 = vector.shape_cast %131 : vector<8xf32> to vector<8x1xf32>
    %133 = vector.broadcast %132 : vector<8x1xf32> to vector<8x16xf32>
    %134 = arith.cmpf oeq, %130, %133 : vector<8x16xf32>
    %cst_56 = arith.constant 1.000000e+09 : f32
    %135 = vector.broadcast %cst_56 : f32 to vector<8x16xf32>
    %136 = arith.select %134, %116, %135 : vector<8x16xi1>, vector<8x16xf32>
    %cst_57 = arith.constant dense<0x7F800000> : vector<8xf32>
    %137 = vector.multi_reduction <minimumf>, %136, %cst_57 [1] : vector<8x16xf32> to vector<8xf32>
    %138 = vector.shape_cast %137 : vector<8xf32> to vector<8x1xf32>
    %139 = vector.broadcast %138 : vector<8x1xf32> to vector<8x16xf32>
    %140 = arith.cmpf oeq, %116, %139 : vector<8x16xf32>
    %141 = arith.select %140, %130, %128 : vector<8x16xi1>, vector<8x16xf32>
    %cst_58 = arith.constant -1.000000e+00 : f32
    %142 = vector.broadcast %cst_58 : f32 to vector<8x16xf32>
    %143 = arith.select %140, %142, %130 : vector<8x16xi1>, vector<8x16xf32>
    %cst_59 = arith.constant dense<0xFF800000> : vector<8xf32>
    %144 = vector.multi_reduction <maximumf>, %143, %cst_59 [1] : vector<8x16xf32> to vector<8xf32>
    %145 = vector.shape_cast %144 : vector<8xf32> to vector<8x1xf32>
    %146 = vector.broadcast %145 : vector<8x1xf32> to vector<8x16xf32>
    %147 = arith.cmpf oeq, %143, %146 : vector<8x16xf32>
    %cst_60 = arith.constant 1.000000e+09 : f32
    %148 = vector.broadcast %cst_60 : f32 to vector<8x16xf32>
    %149 = arith.select %147, %116, %148 : vector<8x16xi1>, vector<8x16xf32>
    %cst_61 = arith.constant dense<0x7F800000> : vector<8xf32>
    %150 = vector.multi_reduction <minimumf>, %149, %cst_61 [1] : vector<8x16xf32> to vector<8xf32>
    %151 = vector.shape_cast %150 : vector<8xf32> to vector<8x1xf32>
    %152 = vector.broadcast %151 : vector<8x1xf32> to vector<8x16xf32>
    %153 = arith.cmpf oeq, %116, %152 : vector<8x16xf32>
    %154 = arith.select %153, %143, %141 : vector<8x16xi1>, vector<8x16xf32>
    %cst_62 = arith.constant -1.000000e+00 : f32
    %155 = vector.broadcast %cst_62 : f32 to vector<8x16xf32>
    %156 = arith.select %153, %155, %143 : vector<8x16xi1>, vector<8x16xf32>
    %cst_63 = arith.constant dense<0xFF800000> : vector<8xf32>
    %157 = vector.multi_reduction <maximumf>, %156, %cst_63 [1] : vector<8x16xf32> to vector<8xf32>
    %158 = vector.shape_cast %157 : vector<8xf32> to vector<8x1xf32>
    %159 = vector.broadcast %158 : vector<8x1xf32> to vector<8x16xf32>
    %160 = arith.cmpf oeq, %156, %159 : vector<8x16xf32>
    %cst_64 = arith.constant 1.000000e+09 : f32
    %161 = vector.broadcast %cst_64 : f32 to vector<8x16xf32>
    %162 = arith.select %160, %116, %161 : vector<8x16xi1>, vector<8x16xf32>
    %cst_65 = arith.constant dense<0x7F800000> : vector<8xf32>
    %163 = vector.multi_reduction <minimumf>, %162, %cst_65 [1] : vector<8x16xf32> to vector<8xf32>
    %164 = vector.shape_cast %163 : vector<8xf32> to vector<8x1xf32>
    %165 = vector.broadcast %164 : vector<8x1xf32> to vector<8x16xf32>
    %166 = arith.cmpf oeq, %116, %165 : vector<8x16xf32>
    %167 = arith.select %166, %156, %154 : vector<8x16xi1>, vector<8x16xf32>
    %c0_66 = arith.constant 0 : index
    %c0_67 = arith.constant 0 : index
    %168 = vector.load %arg11[%c0_66, %c0_67] : memref<16x32xf32, #tpu.memory_space<vmem>>, vector<16x32xf32>
    %cst_68 = arith.constant dense<0.000000e+00> : vector<8x32xf32>
    %169 = tpu.matmul %167, %168, %cst_68 {dimension_numbers = #tpu.dot_dimension_numbers<[1], [0], [0], [1], [0, 0, 1, 1], [], []>} : vector<8x16xf32>, vector<16x32xf32>, vector<8x32xf32> -> vector<8x32xf32>
    %c0_i32 = arith.constant 0 : i32
    %170 = arith.index_cast %c0_i32 : i32 to index
    %c0_69 = arith.constant 0 : index
    %c0_70 = arith.constant 0 : index
    %171 = vector.load %arg12[%170, %c0_69, %c0_70] : memref<4x32x256xf32, #tpu.memory_space<vmem>>, vector<1x32x256xf32>
    %172 = vector.shape_cast %171 : vector<1x32x256xf32> to vector<32x256xf32>
    %cst_71 = arith.constant dense<0.000000e+00> : vector<8x256xf32>
    %173 = tpu.matmul %0, %172, %cst_71 {dimension_numbers = #tpu.dot_dimension_numbers<[1], [0], [0], [1], [0, 0, 1, 1], [], []>} : vector<8x32xf32>, vector<32x256xf32>, vector<8x256xf32> -> vector<8x256xf32>
    %174 = arith.index_cast %c0_i32 : i32 to index
    %c0_72 = arith.constant 0 : index
    %c0_73 = arith.constant 0 : index
    %175 = vector.load %arg13[%174, %c0_72, %c0_73] : memref<4x1x256xf32, #tpu.memory_space<vmem>>, vector<1x1x256xf32>
    %176 = vector.shape_cast %175 : vector<1x1x256xf32> to vector<1x256xf32>
    %177 = vector.broadcast %176 : vector<1x256xf32> to vector<8x256xf32>
    %178 = arith.addf %173, %177 : vector<8x256xf32>
    %cst_74 = arith.constant 5.000000e-01 : f32
    %179 = vector.broadcast %cst_74 : f32 to vector<8x256xf32>
    %180 = arith.mulf %179, %178 : vector<8x256xf32>
    %cst_75 = arith.constant 0.707106769 : f32
    %181 = vector.broadcast %cst_75 : f32 to vector<8x256xf32>
    %182 = arith.mulf %178, %181 : vector<8x256xf32>
    %183 = math.absf %182 : vector<8x256xf32>
    %cst_76 = arith.constant 0.327591091 : f32
    %184 = vector.broadcast %cst_76 : f32 to vector<8x256xf32>
    %185 = arith.mulf %184, %183 : vector<8x256xf32>
    %cst_77 = arith.constant 1.000000e+00 : f32
    %186 = vector.broadcast %cst_77 : f32 to vector<8x256xf32>
    %187 = arith.addf %186, %185 : vector<8x256xf32>
    %188 = tpu.reciprocal %187 {approx = true} : vector<8x256xf32> -> vector<8x256xf32>
    %cst_78 = arith.constant 1.06140542 : f32
    %189 = vector.broadcast %cst_78 : f32 to vector<8x256xf32>
    %190 = arith.mulf %189, %188 : vector<8x256xf32>
    %cst_79 = arith.constant -1.45315206 : f32
    %191 = vector.broadcast %cst_79 : f32 to vector<8x256xf32>
    %192 = arith.addf %190, %191 : vector<8x256xf32>
    %193 = arith.mulf %192, %188 : vector<8x256xf32>
    %cst_80 = arith.constant 1.42141378 : f32
    %194 = vector.broadcast %cst_80 : f32 to vector<8x256xf32>
    %195 = arith.addf %193, %194 : vector<8x256xf32>
    %196 = arith.mulf %195, %188 : vector<8x256xf32>
    %cst_81 = arith.constant -0.284496725 : f32
    %197 = vector.broadcast %cst_81 : f32 to vector<8x256xf32>
    %198 = arith.addf %196, %197 : vector<8x256xf32>
    %199 = arith.mulf %198, %188 : vector<8x256xf32>
    %cst_82 = arith.constant 0.254829586 : f32
    %200 = vector.broadcast %cst_82 : f32 to vector<8x256xf32>
    %201 = arith.addf %199, %200 : vector<8x256xf32>
    %202 = arith.mulf %201, %188 : vector<8x256xf32>
    %cst_83 = arith.constant 0.000000e+00 : f32
    %203 = vector.broadcast %cst_83 : f32 to vector<8x256xf32>
    %204 = arith.subf %203, %183 : vector<8x256xf32>
    %205 = arith.mulf %204, %183 : vector<8x256xf32>
    %206 = math.exp %205 : vector<8x256xf32>
    %207 = arith.mulf %202, %206 : vector<8x256xf32>
    %cst_84 = arith.constant 1.000000e+00 : f32
    %208 = vector.broadcast %cst_84 : f32 to vector<8x256xf32>
    %209 = arith.subf %208, %207 : vector<8x256xf32>
    %cst_85 = arith.constant 0.000000e+00 : f32
    %210 = vector.broadcast %cst_85 : f32 to vector<8x256xf32>
    %211 = arith.cmpf oge, %182, %210 : vector<8x256xf32>
    %cst_86 = arith.constant 0.000000e+00 : f32
    %212 = vector.broadcast %cst_86 : f32 to vector<8x256xf32>
    %213 = arith.subf %212, %209 : vector<8x256xf32>
    %214 = arith.select %211, %209, %213 : vector<8x256xi1>, vector<8x256xf32>
    %cst_87 = arith.constant 1.000000e+00 : f32
    %215 = vector.broadcast %cst_87 : f32 to vector<8x256xf32>
    %216 = arith.addf %215, %214 : vector<8x256xf32>
    %217 = arith.mulf %180, %216 : vector<8x256xf32>
    %218 = arith.index_cast %c0_i32 : i32 to index
    %c0_88 = arith.constant 0 : index
    %c0_89 = arith.constant 0 : index
    %219 = vector.load %arg14[%218, %c0_88, %c0_89] : memref<4x16x256xf32, #tpu.memory_space<vmem>>, vector<1x16x256xf32>
    %220 = vector.shape_cast %219 : vector<1x16x256xf32> to vector<16x256xf32>
    %cst_90 = arith.constant dense<0.000000e+00> : vector<8x256xf32>
    %221 = tpu.matmul %167, %220, %cst_90 {dimension_numbers = #tpu.dot_dimension_numbers<[1], [0], [0], [1], [0, 0, 1, 1], [], []>} : vector<8x16xf32>, vector<16x256xf32>, vector<8x256xf32> -> vector<8x256xf32>
    %222 = arith.mulf %217, %221 : vector<8x256xf32>
    %223 = arith.index_cast %c0_i32 : i32 to index
    %c0_91 = arith.constant 0 : index
    %c0_92 = arith.constant 0 : index
    %224 = vector.load %arg15[%223, %c0_91, %c0_92] : memref<4x256x32xf32, #tpu.memory_space<vmem>>, vector<1x256x32xf32>
    %225 = vector.shape_cast %224 : vector<1x256x32xf32> to vector<256x32xf32>
    %cst_93 = arith.constant dense<0.000000e+00> : vector<8x32xf32>
    %226 = tpu.matmul %222, %225, %cst_93 {dimension_numbers = #tpu.dot_dimension_numbers<[1], [0], [0], [1], [0, 0, 1, 1], [], []>} : vector<8x256xf32>, vector<256x32xf32>, vector<8x32xf32> -> vector<8x32xf32>
    %227 = arith.addf %169, %226 : vector<8x32xf32>
    %c1_i32 = arith.constant 1 : i32
    %228 = arith.index_cast %c1_i32 : i32 to index
    %c0_94 = arith.constant 0 : index
    %c0_95 = arith.constant 0 : index
    %229 = vector.load %arg12[%228, %c0_94, %c0_95] : memref<4x32x256xf32, #tpu.memory_space<vmem>>, vector<1x32x256xf32>
    %230 = vector.shape_cast %229 : vector<1x32x256xf32> to vector<32x256xf32>
    %cst_96 = arith.constant dense<0.000000e+00> : vector<8x256xf32>
    %231 = tpu.matmul %0, %230, %cst_96 {dimension_numbers = #tpu.dot_dimension_numbers<[1], [0], [0], [1], [0, 0, 1, 1], [], []>} : vector<8x32xf32>, vector<32x256xf32>, vector<8x256xf32> -> vector<8x256xf32>
    %232 = arith.index_cast %c1_i32 : i32 to index
    %c0_97 = arith.constant 0 : index
    %c0_98 = arith.constant 0 : index
    %233 = vector.load %arg13[%232, %c0_97, %c0_98] : memref<4x1x256xf32, #tpu.memory_space<vmem>>, vector<1x1x256xf32>
    %234 = vector.shape_cast %233 : vector<1x1x256xf32> to vector<1x256xf32>
    %235 = vector.broadcast %234 : vector<1x256xf32> to vector<8x256xf32>
    %236 = arith.addf %231, %235 : vector<8x256xf32>
    %cst_99 = arith.constant 5.000000e-01 : f32
    %237 = vector.broadcast %cst_99 : f32 to vector<8x256xf32>
    %238 = arith.mulf %237, %236 : vector<8x256xf32>
    %cst_100 = arith.constant 0.707106769 : f32
    %239 = vector.broadcast %cst_100 : f32 to vector<8x256xf32>
    %240 = arith.mulf %236, %239 : vector<8x256xf32>
    %241 = math.absf %240 : vector<8x256xf32>
    %cst_101 = arith.constant 0.327591091 : f32
    %242 = vector.broadcast %cst_101 : f32 to vector<8x256xf32>
    %243 = arith.mulf %242, %241 : vector<8x256xf32>
    %cst_102 = arith.constant 1.000000e+00 : f32
    %244 = vector.broadcast %cst_102 : f32 to vector<8x256xf32>
    %245 = arith.addf %244, %243 : vector<8x256xf32>
    %246 = tpu.reciprocal %245 {approx = true} : vector<8x256xf32> -> vector<8x256xf32>
    %cst_103 = arith.constant 1.06140542 : f32
    %247 = vector.broadcast %cst_103 : f32 to vector<8x256xf32>
    %248 = arith.mulf %247, %246 : vector<8x256xf32>
    %cst_104 = arith.constant -1.45315206 : f32
    %249 = vector.broadcast %cst_104 : f32 to vector<8x256xf32>
    %250 = arith.addf %248, %249 : vector<8x256xf32>
    %251 = arith.mulf %250, %246 : vector<8x256xf32>
    %cst_105 = arith.constant 1.42141378 : f32
    %252 = vector.broadcast %cst_105 : f32 to vector<8x256xf32>
    %253 = arith.addf %251, %252 : vector<8x256xf32>
    %254 = arith.mulf %253, %246 : vector<8x256xf32>
    %cst_106 = arith.constant -0.284496725 : f32
    %255 = vector.broadcast %cst_106 : f32 to vector<8x256xf32>
    %256 = arith.addf %254, %255 : vector<8x256xf32>
    %257 = arith.mulf %256, %246 : vector<8x256xf32>
    %cst_107 = arith.constant 0.254829586 : f32
    %258 = vector.broadcast %cst_107 : f32 to vector<8x256xf32>
    %259 = arith.addf %257, %258 : vector<8x256xf32>
    %260 = arith.mulf %259, %246 : vector<8x256xf32>
    %cst_108 = arith.constant 0.000000e+00 : f32
    %261 = vector.broadcast %cst_108 : f32 to vector<8x256xf32>
    %262 = arith.subf %261, %241 : vector<8x256xf32>
    %263 = arith.mulf %262, %241 : vector<8x256xf32>
    %264 = math.exp %263 : vector<8x256xf32>
    %265 = arith.mulf %260, %264 : vector<8x256xf32>
    %cst_109 = arith.constant 1.000000e+00 : f32
    %266 = vector.broadcast %cst_109 : f32 to vector<8x256xf32>
    %267 = arith.subf %266, %265 : vector<8x256xf32>
    %cst_110 = arith.constant 0.000000e+00 : f32
    %268 = vector.broadcast %cst_110 : f32 to vector<8x256xf32>
    %269 = arith.cmpf oge, %240, %268 : vector<8x256xf32>
    %cst_111 = arith.constant 0.000000e+00 : f32
    %270 = vector.broadcast %cst_111 : f32 to vector<8x256xf32>
    %271 = arith.subf %270, %267 : vector<8x256xf32>
    %272 = arith.select %269, %267, %271 : vector<8x256xi1>, vector<8x256xf32>
    %cst_112 = arith.constant 1.000000e+00 : f32
    %273 = vector.broadcast %cst_112 : f32 to vector<8x256xf32>
    %274 = arith.addf %273, %272 : vector<8x256xf32>
    %275 = arith.mulf %238, %274 : vector<8x256xf32>
    %276 = arith.index_cast %c1_i32 : i32 to index
    %c0_113 = arith.constant 0 : index
    %c0_114 = arith.constant 0 : index
    %277 = vector.load %arg14[%276, %c0_113, %c0_114] : memref<4x16x256xf32, #tpu.memory_space<vmem>>, vector<1x16x256xf32>
    %278 = vector.shape_cast %277 : vector<1x16x256xf32> to vector<16x256xf32>
    %cst_115 = arith.constant dense<0.000000e+00> : vector<8x256xf32>
    %279 = tpu.matmul %167, %278, %cst_115 {dimension_numbers = #tpu.dot_dimension_numbers<[1], [0], [0], [1], [0, 0, 1, 1], [], []>} : vector<8x16xf32>, vector<16x256xf32>, vector<8x256xf32> -> vector<8x256xf32>
    %280 = arith.mulf %275, %279 : vector<8x256xf32>
    %281 = arith.index_cast %c1_i32 : i32 to index
    %c0_116 = arith.constant 0 : index
    %c0_117 = arith.constant 0 : index
    %282 = vector.load %arg15[%281, %c0_116, %c0_117] : memref<4x256x32xf32, #tpu.memory_space<vmem>>, vector<1x256x32xf32>
    %283 = vector.shape_cast %282 : vector<1x256x32xf32> to vector<256x32xf32>
    %cst_118 = arith.constant dense<0.000000e+00> : vector<8x32xf32>
    %284 = tpu.matmul %280, %283, %cst_118 {dimension_numbers = #tpu.dot_dimension_numbers<[1], [0], [0], [1], [0, 0, 1, 1], [], []>} : vector<8x256xf32>, vector<256x32xf32>, vector<8x32xf32> -> vector<8x32xf32>
    %285 = arith.addf %227, %284 : vector<8x32xf32>
    %c2_i32 = arith.constant 2 : i32
    %286 = arith.index_cast %c2_i32 : i32 to index
    %c0_119 = arith.constant 0 : index
    %c0_120 = arith.constant 0 : index
    %287 = vector.load %arg12[%286, %c0_119, %c0_120] : memref<4x32x256xf32, #tpu.memory_space<vmem>>, vector<1x32x256xf32>
    %288 = vector.shape_cast %287 : vector<1x32x256xf32> to vector<32x256xf32>
    %cst_121 = arith.constant dense<0.000000e+00> : vector<8x256xf32>
    %289 = tpu.matmul %0, %288, %cst_121 {dimension_numbers = #tpu.dot_dimension_numbers<[1], [0], [0], [1], [0, 0, 1, 1], [], []>} : vector<8x32xf32>, vector<32x256xf32>, vector<8x256xf32> -> vector<8x256xf32>
    %290 = arith.index_cast %c2_i32 : i32 to index
    %c0_122 = arith.constant 0 : index
    %c0_123 = arith.constant 0 : index
    %291 = vector.load %arg13[%290, %c0_122, %c0_123] : memref<4x1x256xf32, #tpu.memory_space<vmem>>, vector<1x1x256xf32>
    %292 = vector.shape_cast %291 : vector<1x1x256xf32> to vector<1x256xf32>
    %293 = vector.broadcast %292 : vector<1x256xf32> to vector<8x256xf32>
    %294 = arith.addf %289, %293 : vector<8x256xf32>
    %cst_124 = arith.constant 5.000000e-01 : f32
    %295 = vector.broadcast %cst_124 : f32 to vector<8x256xf32>
    %296 = arith.mulf %295, %294 : vector<8x256xf32>
    %cst_125 = arith.constant 0.707106769 : f32
    %297 = vector.broadcast %cst_125 : f32 to vector<8x256xf32>
    %298 = arith.mulf %294, %297 : vector<8x256xf32>
    %299 = math.absf %298 : vector<8x256xf32>
    %cst_126 = arith.constant 0.327591091 : f32
    %300 = vector.broadcast %cst_126 : f32 to vector<8x256xf32>
    %301 = arith.mulf %300, %299 : vector<8x256xf32>
    %cst_127 = arith.constant 1.000000e+00 : f32
    %302 = vector.broadcast %cst_127 : f32 to vector<8x256xf32>
    %303 = arith.addf %302, %301 : vector<8x256xf32>
    %304 = tpu.reciprocal %303 {approx = true} : vector<8x256xf32> -> vector<8x256xf32>
    %cst_128 = arith.constant 1.06140542 : f32
    %305 = vector.broadcast %cst_128 : f32 to vector<8x256xf32>
    %306 = arith.mulf %305, %304 : vector<8x256xf32>
    %cst_129 = arith.constant -1.45315206 : f32
    %307 = vector.broadcast %cst_129 : f32 to vector<8x256xf32>
    %308 = arith.addf %306, %307 : vector<8x256xf32>
    %309 = arith.mulf %308, %304 : vector<8x256xf32>
    %cst_130 = arith.constant 1.42141378 : f32
    %310 = vector.broadcast %cst_130 : f32 to vector<8x256xf32>
    %311 = arith.addf %309, %310 : vector<8x256xf32>
    %312 = arith.mulf %311, %304 : vector<8x256xf32>
    %cst_131 = arith.constant -0.284496725 : f32
    %313 = vector.broadcast %cst_131 : f32 to vector<8x256xf32>
    %314 = arith.addf %312, %313 : vector<8x256xf32>
    %315 = arith.mulf %314, %304 : vector<8x256xf32>
    %cst_132 = arith.constant 0.254829586 : f32
    %316 = vector.broadcast %cst_132 : f32 to vector<8x256xf32>
    %317 = arith.addf %315, %316 : vector<8x256xf32>
    %318 = arith.mulf %317, %304 : vector<8x256xf32>
    %cst_133 = arith.constant 0.000000e+00 : f32
    %319 = vector.broadcast %cst_133 : f32 to vector<8x256xf32>
    %320 = arith.subf %319, %299 : vector<8x256xf32>
    %321 = arith.mulf %320, %299 : vector<8x256xf32>
    %322 = math.exp %321 : vector<8x256xf32>
    %323 = arith.mulf %318, %322 : vector<8x256xf32>
    %cst_134 = arith.constant 1.000000e+00 : f32
    %324 = vector.broadcast %cst_134 : f32 to vector<8x256xf32>
    %325 = arith.subf %324, %323 : vector<8x256xf32>
    %cst_135 = arith.constant 0.000000e+00 : f32
    %326 = vector.broadcast %cst_135 : f32 to vector<8x256xf32>
    %327 = arith.cmpf oge, %298, %326 : vector<8x256xf32>
    %cst_136 = arith.constant 0.000000e+00 : f32
    %328 = vector.broadcast %cst_136 : f32 to vector<8x256xf32>
    %329 = arith.subf %328, %325 : vector<8x256xf32>
    %330 = arith.select %327, %325, %329 : vector<8x256xi1>, vector<8x256xf32>
    %cst_137 = arith.constant 1.000000e+00 : f32
    %331 = vector.broadcast %cst_137 : f32 to vector<8x256xf32>
    %332 = arith.addf %331, %330 : vector<8x256xf32>
    %333 = arith.mulf %296, %332 : vector<8x256xf32>
    %334 = arith.index_cast %c2_i32 : i32 to index
    %c0_138 = arith.constant 0 : index
    %c0_139 = arith.constant 0 : index
    %335 = vector.load %arg14[%334, %c0_138, %c0_139] : memref<4x16x256xf32, #tpu.memory_space<vmem>>, vector<1x16x256xf32>
    %336 = vector.shape_cast %335 : vector<1x16x256xf32> to vector<16x256xf32>
    %cst_140 = arith.constant dense<0.000000e+00> : vector<8x256xf32>
    %337 = tpu.matmul %167, %336, %cst_140 {dimension_numbers = #tpu.dot_dimension_numbers<[1], [0], [0], [1], [0, 0, 1, 1], [], []>} : vector<8x16xf32>, vector<16x256xf32>, vector<8x256xf32> -> vector<8x256xf32>
    %338 = arith.mulf %333, %337 : vector<8x256xf32>
    %339 = arith.index_cast %c2_i32 : i32 to index
    %c0_141 = arith.constant 0 : index
    %c0_142 = arith.constant 0 : index
    %340 = vector.load %arg15[%339, %c0_141, %c0_142] : memref<4x256x32xf32, #tpu.memory_space<vmem>>, vector<1x256x32xf32>
    %341 = vector.shape_cast %340 : vector<1x256x32xf32> to vector<256x32xf32>
    %cst_143 = arith.constant dense<0.000000e+00> : vector<8x32xf32>
    %342 = tpu.matmul %338, %341, %cst_143 {dimension_numbers = #tpu.dot_dimension_numbers<[1], [0], [0], [1], [0, 0, 1, 1], [], []>} : vector<8x256xf32>, vector<256x32xf32>, vector<8x32xf32> -> vector<8x32xf32>
    %343 = arith.addf %285, %342 : vector<8x32xf32>
    %c3_i32 = arith.constant 3 : i32
    %344 = arith.index_cast %c3_i32 : i32 to index
    %c0_144 = arith.constant 0 : index
    %c0_145 = arith.constant 0 : index
    %345 = vector.load %arg12[%344, %c0_144, %c0_145] : memref<4x32x256xf32, #tpu.memory_space<vmem>>, vector<1x32x256xf32>
    %346 = vector.shape_cast %345 : vector<1x32x256xf32> to vector<32x256xf32>
    %cst_146 = arith.constant dense<0.000000e+00> : vector<8x256xf32>
    %347 = tpu.matmul %0, %346, %cst_146 {dimension_numbers = #tpu.dot_dimension_numbers<[1], [0], [0], [1], [0, 0, 1, 1], [], []>} : vector<8x32xf32>, vector<32x256xf32>, vector<8x256xf32> -> vector<8x256xf32>
    %348 = arith.index_cast %c3_i32 : i32 to index
    %c0_147 = arith.constant 0 : index
    %c0_148 = arith.constant 0 : index
    %349 = vector.load %arg13[%348, %c0_147, %c0_148] : memref<4x1x256xf32, #tpu.memory_space<vmem>>, vector<1x1x256xf32>
    %350 = vector.shape_cast %349 : vector<1x1x256xf32> to vector<1x256xf32>
    %351 = vector.broadcast %350 : vector<1x256xf32> to vector<8x256xf32>
    %352 = arith.addf %347, %351 : vector<8x256xf32>
    %cst_149 = arith.constant 5.000000e-01 : f32
    %353 = vector.broadcast %cst_149 : f32 to vector<8x256xf32>
    %354 = arith.mulf %353, %352 : vector<8x256xf32>
    %cst_150 = arith.constant 0.707106769 : f32
    %355 = vector.broadcast %cst_150 : f32 to vector<8x256xf32>
    %356 = arith.mulf %352, %355 : vector<8x256xf32>
    %357 = math.absf %356 : vector<8x256xf32>
    %cst_151 = arith.constant 0.327591091 : f32
    %358 = vector.broadcast %cst_151 : f32 to vector<8x256xf32>
    %359 = arith.mulf %358, %357 : vector<8x256xf32>
    %cst_152 = arith.constant 1.000000e+00 : f32
    %360 = vector.broadcast %cst_152 : f32 to vector<8x256xf32>
    %361 = arith.addf %360, %359 : vector<8x256xf32>
    %362 = tpu.reciprocal %361 {approx = true} : vector<8x256xf32> -> vector<8x256xf32>
    %cst_153 = arith.constant 1.06140542 : f32
    %363 = vector.broadcast %cst_153 : f32 to vector<8x256xf32>
    %364 = arith.mulf %363, %362 : vector<8x256xf32>
    %cst_154 = arith.constant -1.45315206 : f32
    %365 = vector.broadcast %cst_154 : f32 to vector<8x256xf32>
    %366 = arith.addf %364, %365 : vector<8x256xf32>
    %367 = arith.mulf %366, %362 : vector<8x256xf32>
    %cst_155 = arith.constant 1.42141378 : f32
    %368 = vector.broadcast %cst_155 : f32 to vector<8x256xf32>
    %369 = arith.addf %367, %368 : vector<8x256xf32>
    %370 = arith.mulf %369, %362 : vector<8x256xf32>
    %cst_156 = arith.constant -0.284496725 : f32
    %371 = vector.broadcast %cst_156 : f32 to vector<8x256xf32>
    %372 = arith.addf %370, %371 : vector<8x256xf32>
    %373 = arith.mulf %372, %362 : vector<8x256xf32>
    %cst_157 = arith.constant 0.254829586 : f32
    %374 = vector.broadcast %cst_157 : f32 to vector<8x256xf32>
    %375 = arith.addf %373, %374 : vector<8x256xf32>
    %376 = arith.mulf %375, %362 : vector<8x256xf32>
    %cst_158 = arith.constant 0.000000e+00 : f32
    %377 = vector.broadcast %cst_158 : f32 to vector<8x256xf32>
    %378 = arith.subf %377, %357 : vector<8x256xf32>
    %379 = arith.mulf %378, %357 : vector<8x256xf32>
    %380 = math.exp %379 : vector<8x256xf32>
    %381 = arith.mulf %376, %380 : vector<8x256xf32>
    %cst_159 = arith.constant 1.000000e+00 : f32
    %382 = vector.broadcast %cst_159 : f32 to vector<8x256xf32>
    %383 = arith.subf %382, %381 : vector<8x256xf32>
    %cst_160 = arith.constant 0.000000e+00 : f32
    %384 = vector.broadcast %cst_160 : f32 to vector<8x256xf32>
    %385 = arith.cmpf oge, %356, %384 : vector<8x256xf32>
    %cst_161 = arith.constant 0.000000e+00 : f32
    %386 = vector.broadcast %cst_161 : f32 to vector<8x256xf32>
    %387 = arith.subf %386, %383 : vector<8x256xf32>
    %388 = arith.select %385, %383, %387 : vector<8x256xi1>, vector<8x256xf32>
    %cst_162 = arith.constant 1.000000e+00 : f32
    %389 = vector.broadcast %cst_162 : f32 to vector<8x256xf32>
    %390 = arith.addf %389, %388 : vector<8x256xf32>
    %391 = arith.mulf %354, %390 : vector<8x256xf32>
    %392 = arith.index_cast %c3_i32 : i32 to index
    %c0_163 = arith.constant 0 : index
    %c0_164 = arith.constant 0 : index
    %393 = vector.load %arg14[%392, %c0_163, %c0_164] : memref<4x16x256xf32, #tpu.memory_space<vmem>>, vector<1x16x256xf32>
    %394 = vector.shape_cast %393 : vector<1x16x256xf32> to vector<16x256xf32>
    %cst_165 = arith.constant dense<0.000000e+00> : vector<8x256xf32>
    %395 = tpu.matmul %167, %394, %cst_165 {dimension_numbers = #tpu.dot_dimension_numbers<[1], [0], [0], [1], [0, 0, 1, 1], [], []>} : vector<8x16xf32>, vector<16x256xf32>, vector<8x256xf32> -> vector<8x256xf32>
    %396 = arith.mulf %391, %395 : vector<8x256xf32>
    %397 = arith.index_cast %c3_i32 : i32 to index
    %c0_166 = arith.constant 0 : index
    %c0_167 = arith.constant 0 : index
    %398 = vector.load %arg15[%397, %c0_166, %c0_167] : memref<4x256x32xf32, #tpu.memory_space<vmem>>, vector<1x256x32xf32>
    %399 = vector.shape_cast %398 : vector<1x256x32xf32> to vector<256x32xf32>
    %cst_168 = arith.constant dense<0.000000e+00> : vector<8x32xf32>
    %400 = tpu.matmul %396, %399, %cst_168 {dimension_numbers = #tpu.dot_dimension_numbers<[1], [0], [0], [1], [0, 0, 1, 1], [], []>} : vector<8x256xf32>, vector<256x32xf32>, vector<8x32xf32> -> vector<8x32xf32>
    %401 = arith.addf %343, %400 : vector<8x32xf32>
    %c4_i32 = arith.constant 4 : i32
    %c0_169 = arith.constant 0 : index
    %c0_170 = arith.constant 0 : index
    %402 = vector.load %arg16[%c0_169, %c0_170] : memref<8x32xf32, #tpu.memory_space<vmem>>, vector<8x32xf32>
    tpu.vector_store %arg16[%c0_169, %c0_170], %401 {strides = array<i32>} : memref<8x32xf32, #tpu.memory_space<vmem>>, vector<8x32xf32>,
    return
  }
  func.func @transform_0(%arg0: i32) -> (i32, i32) {
    %c0_i32 = arith.constant 0 : i32
    %c0_i32_0 = arith.constant 0 : i32
    return %arg0, %c0_i32 : i32, i32
  }
  func.func @transform_1(%arg0: i32) -> (i32, i32) {
    %c0_i32 = arith.constant 0 : i32
    %c0_i32_0 = arith.constant 0 : i32
    %c0_i32_1 = arith.constant 0 : i32
    return %c0_i32, %c0_i32_0 : i32, i32
  }
  func.func @transform_2(%arg0: i32) -> (i32, i32) {
    %c0_i32 = arith.constant 0 : i32
    %c0_i32_0 = arith.constant 0 : i32
    %c0_i32_1 = arith.constant 0 : i32
    return %c0_i32, %c0_i32_0 : i32, i32
  }
  func.func @transform_3(%arg0: i32) -> (i32, i32) {
    %c0_i32 = arith.constant 0 : i32
    %c0_i32_0 = arith.constant 0 : i32
    %c0_i32_1 = arith.constant 0 : i32
    return %c0_i32, %c0_i32_0 : i32, i32
  }
  func.func @transform_4(%arg0: i32) -> (i32, i32) {
    %c0_i32 = arith.constant 0 : i32
    %c0_i32_0 = arith.constant 0 : i32
    %c0_i32_1 = arith.constant 0 : i32
    return %c0_i32, %c0_i32_0 : i32, i32
  }
  func.func @transform_5(%arg0: i32) -> (i32, i32) {
    %c0_i32 = arith.constant 0 : i32
    %c0_i32_0 = arith.constant 0 : i32
    %c0_i32_1 = arith.constant 0 : i32
    return %c0_i32, %c0_i32_0 : i32, i32
  }
  func.func @transform_6(%arg0: i32) -> (i32, i32) {
    %c0_i32 = arith.constant 0 : i32
    %c0_i32_0 = arith.constant 0 : i32
    %c0_i32_1 = arith.constant 0 : i32
    return %c0_i32, %c0_i32_0 : i32, i32
  }
  func.func @transform_7(%arg0: i32) -> (i32, i32) {
    %c0_i32 = arith.constant 0 : i32
    %c0_i32_0 = arith.constant 0 : i32
    %c0_i32_1 = arith.constant 0 : i32
    return %c0_i32, %c0_i32_0 : i32, i32
  }
  func.func @transform_8(%arg0: i32) -> (i32, i32) {
    %c0_i32 = arith.constant 0 : i32
    %c0_i32_0 = arith.constant 0 : i32
    %c0_i32_1 = arith.constant 0 : i32
    return %c0_i32, %c0_i32_0 : i32, i32
  }
  func.func @transform_9(%arg0: i32) -> (i32, i32) {
    %c0_i32 = arith.constant 0 : i32
    %c0_i32_0 = arith.constant 0 : i32
    %c0_i32_1 = arith.constant 0 : i32
    return %c0_i32, %c0_i32_0 : i32, i32
  }
  func.func @transform_10(%arg0: i32) -> (i32, i32) {
    %c0_i32 = arith.constant 0 : i32
    %c0_i32_0 = arith.constant 0 : i32
    %c0_i32_1 = arith.constant 0 : i32
    return %c0_i32, %c0_i32_0 : i32, i32
  }
  func.func @transform_11(%arg0: i32) -> (i32, i32, i32) {
    %c0_i32 = arith.constant 0 : i32
    %c0_i32_0 = arith.constant 0 : i32
    %c0_i32_1 = arith.constant 0 : i32
    %c0_i32_2 = arith.constant 0 : i32
    return %c0_i32, %c0_i32_0, %c0_i32_1 : i32, i32, i32
  }
  func.func @transform_12(%arg0: i32) -> (i32, i32, i32) {
    %c0_i32 = arith.constant 0 : i32
    %c0_i32_0 = arith.constant 0 : i32
    %c0_i32_1 = arith.constant 0 : i32
    %c0_i32_2 = arith.constant 0 : i32
    return %c0_i32, %c0_i32_0, %c0_i32_1 : i32, i32, i32
  }
  func.func @transform_13(%arg0: i32) -> (i32, i32, i32) {
    %c0_i32 = arith.constant 0 : i32
    %c0_i32_0 = arith.constant 0 : i32
    %c0_i32_1 = arith.constant 0 : i32
    %c0_i32_2 = arith.constant 0 : i32
    return %c0_i32, %c0_i32_0, %c0_i32_1 : i32, i32, i32
  }
  func.func @transform_14(%arg0: i32) -> (i32, i32, i32) {
    %c0_i32 = arith.constant 0 : i32
    %c0_i32_0 = arith.constant 0 : i32
    %c0_i32_1 = arith.constant 0 : i32
    %c0_i32_2 = arith.constant 0 : i32
    return %c0_i32, %c0_i32_0, %c0_i32_1 : i32, i32, i32
  }
  func.func @transform_15(%arg0: i32) -> (i32, i32) {
    %c0_i32 = arith.constant 0 : i32
    %c0_i32_0 = arith.constant 0 : i32
    return %arg0, %c0_i32 : i32, i32
  }
}

</mosaic_0001>

<bundles_post_ra>
// kernel: enhanced_moe_forward.1
= control target key start
LH: loop header
LB: loop body
LE: loop exit
PB: predicated region body
PF: predicated region fallthrough
CT: control target
= control target key end

     0   :  { %s3073_s0 = inlined_call_operand.vmem [shape: f32[16,32], index: 0, kind: input, shape index: {}]   ;;  %s3074_s1 = inlined_call_operand.vmem [shape: f32[32,16], index: 1, kind: input, shape index: {}]   ;;  %s3075_s2 = inlined_call_operand.vmem [shape: f32[1,16], index: 2, kind: input, shape index: {}]   ;;  %s3076_s3 = inlined_call_operand.vmem [shape: f32[32,16], index: 3, kind: input, shape index: {}]   ;;  %s3077_s4 = inlined_call_operand.vmem [shape: f32[1,16], index: 4, kind: input, shape index: {}]   ;;  %s3078_s5 = inlined_call_operand.vmem [shape: f32[32,8], index: 5, kind: input, shape index: {}]   ;;  %s3079_s6 = inlined_call_operand.vmem [shape: f32[1,8], index: 6, kind: input, shape index: {}]   ;;  %s3080_s7 = inlined_call_operand.vmem [shape: f32[1,8], index: 7, kind: input, shape index: {}]   ;;  %s3081_s8 = inlined_call_operand.<no memory space> [shape: f32[1,1], index: 8, kind: input, shape index: {}]   ;;  %s3082_s9 = inlined_call_operand.vmem [shape: f32[16,16], index: 9, kind: input, shape index: {}]   ;;  %s3083_s10 = inlined_call_operand.vmem [shape: f32[16,32], index: 10, kind: input, shape index: {}]   ;;  %s3084_s11 = inlined_call_operand.vmem [shape: f32[4,32,256], index: 11, kind: input, shape index: {}]   ;;  %s3085_s12 = inlined_call_operand.vmem [shape: f32[4,1,256], index: 12, kind: input, shape index: {}]   ;;  %s3086_s13 = inlined_call_operand.vmem [shape: f32[4,16,256], index: 13, kind: input, shape index: {}]   ;;  %s3087_s14 = inlined_call_operand.vmem [shape: f32[4,256,32], index: 14, kind: input, shape index: {}]   ;;  %s3088_s15 = inlined_call_operand.hbm [shape: f32[16,32], index: 15, kind: output, shape index: {}]  }
   0x1   :  { %v20_v0 = vstv %s3081_s8 }
   0x2   :  { %21 = vst [vmem:[#allocation2] sm:$0x1] %v20_v0 }
   0x3   :  { %22 = vsyncpa [#allocation4], 0 }
   0x4   :  { %24 = vsyncpa [#allocation4 + $0x1], 0  ;;  %s2229_s20 = smov 0   ;;  %s2231_s21 = smov 0  }
   0x5   :  { %s2233_s22 = smov 0   ;;  %s2235_s23 = smov 0  }
   0x6 LB: > { %3094 = sst [smem:[#allocation6_spill]] %s2131_s20  ;;  %s2250_s8 = sadd.s32 4294967295, %s2143_s23   ;;  %s2143_s23 = sphi %s2235_s23, %s3103_s23   ;;  %s2139_s22 = sphi %s2233_s22, %s3105_s22   ;;  %s2135_s21 = sphi %s2231_s21, %s3107_s21   ;;  %s2131_s20 = sphi %s2229_s20, %s3106_s20  }
   0x7   : > { %3095 = sst [smem:[#allocation7_spill]] %s2139_s22  ;;  %s1815_s24 = sadd.s32 4294967294, %s2143_s23  }
   0x8   : > { %s2254_s25 = sadd.s32 1, %s2143_s23   ;;  %s357_s26 = sadd.s32 1, %s2139_s22 }
   0x9   : > { %3096 = sst [smem:[#allocation8_spill]] %s2254_s25  ;;  %s354_s27 = ssub.s32 %s2143_s23, %s2254_s25 }
   0xa   : > { %p367_p0 = scmp.ne.s32.totalorder %s2139_s22, %s2135_s21  ;;  %p355_p1 = scmp.eq.s32.totalorder %s354_s27, 0 }
   0xb   : > { %p368_p2 = scmp.eq.s32.totalorder %s2250_s8, 1  ;;  %p373_p3 = scmp.ne.s32.totalorder %s2135_s21, %s2131_s20 }
   0xc   : > { %p374_p4 = scmp.eq.s32.totalorder %s1815_s24, 1  ;;  %p1818_p7 = scmp.ge.s32.totalorder %s2143_s23, 1 }
   0xd   : > { %s2265_s28 = scalar_select %p355_p1, %s2139_s22, %s357_s26  }
   0xe   : > { %p2267_p5 = por %p368_p2, %p367_p0  ;;  %p2271_p6 = por %p374_p4, %p373_p3 }
   0xf   : > { %3097 = sst [smem:[#allocation9_spill]] %s2265_s28  ;;  %p441_p8 = scmp.lt.s32.totalorder %s2143_s23, 3 }
  0x10   : > { %s3099_s30 = scalar_select %p2271_p6, 1, 0 }
  0x11   : > { %p442_p9 = pnand %p1818_p7, %p441_p8 }
  0x12   : > { %3100 = sst [smem:[#allocation10_spill]] %s3099_s30  ;;  %p488_p10 = scmp.lt.s32.totalorder (!%p442_p9), %s2250_s8, 1 }
  0x13   : > { %445 = sbr.rel (%p442_p9) target bundleno = 2287 (0x8ef), region = 80  ;;  %s485_s28 = sand.u32 (!%p442_p9), 1, %s2135_s21  }
  0x14   : > { %s1819_s25 = sshll.u32 (!%p442_p9), %s485_s28, 3 }
  0x15   : > { %s487_s17 = scalar_lea.vmem (!%p442_p9), [#allocation3], %s1819_s25 }
  0x16   : > { %s1753_s18 = sshll.u32 (!%p442_p9), %s487_s17, 4  ;;  %s1754_s18 = int_to_ptr.vmem [resolvable:$true] %s1753_s18 }
  0x18   : > { %v496_v1 = vld [vmem:[%s3074_s1 + $0x18] sm:$0xff]  ;;  %v495_v2 = vld [vmem:[%s3074_s1 + $0x10] sm:$0xff]  ;;  %v494_v3 = vld [vmem:[%s3074_s1 + $0x8] sm:$0xff]  ;;  %s489_s27 = scalar_select %p488_p10, %s2250_s8, 1  ;;  %vm501_vm0 = vcmask 261120   ;;  %vm525_vm1 = vcmask 130048  }
  0x19   : > { %517 = vmatpush.msra.mxu0 %v496_v1  ;;  %v565_v4 = vld [vmem:[%s3078_s5 + $0x18] sm:$0xff]  ;;  %v493_v5 = vld [vmem:[%s3074_s1] sm:$0xff]  ;;  %v564_v6 = vld [vmem:[%s3078_s5 + $0x10] sm:$0xff]  ;;  %vm621_vm3 = vcmask 64512   ;;  %v2145_v0 = vmov 0  }
  0x1a   : > { %582 = vmatpush.msra.mxu3 %v565_v4  ;;  %s1820_s19 = sshll.u32 %s489_s27, 3  ;;  %v652_v7 = vld [vmem:[%s3076_s3 + $0x18] sm:$0xff]  ;;  %v563_v8 = vld [vmem:[%s3078_s5 + $0x8] sm:$0xff]  ;;  %v562_v10 = vld [vmem:[%s3078_s5] sm:$0xff]  ;;  %2023 = vset.pattern.permute.xlu1 %v2145_v0  ;;  %s1979_s27 = sshll.u32 %s2250_s8, 3 }
  0x1b   : > { %518 = vmatpush.msra.mxu0 %v495_v2  ;;  %s2306_s16 = scalar_lea.vmem %s3073_s0, %s1820_s19  ;;  %v651_v11 = vld [vmem:[%s3076_s3 + $0x10] sm:$0xff]  ;;  %v650_v12 = vld [vmem:[%s3076_s3 + $0x8] sm:$0xff]  ;;  %v649_v13 = vld [vmem:[%s3076_s3] sm:$0xff]  ;;  %2022 = vset.pattern.permute.xlu2 %v2145_v0  ;;  %s1751_s30 = scalar_lea.hbm %s3088_s15, %s1979_s27 }
  0x1c   : > { %583 = vmatpush.msra.mxu3 %v564_v6  ;;  %v2309_v9 = vld [vmem:[%s2306_s16] sm:$0xff]  ;;  %v684_v34 = vld [vmem:[%s3082_s9 + $0x8] sm:$0xff]  ;;  %2024 = vset.pattern.permute.xlu0 %v2145_v0  ;;  %s1755_s19 = sshll.u32 %s1751_s30, 4  ;;  %s1741_s8 = scalar_lea.sflag [#allocation4], %s485_s28  ;;  %s1756_s19 = int_to_ptr.hbm [resolvable:$true] %s1755_s19 }
  0x1d   : > { %519 = vmatpush.msra.mxu0 %v494_v3  ;;  %v2026_v15 = vld [vmem:[%s3077_s4] ss:$0 sm:$0xff]  ;;  %s2095_s24 = sshra.s32 %s1756_s19, 4  ;;  %s2101_s27 = scalar_lea.hbm %s3088_s15, 16  ;;  %s2096_s24 = int_to_ptr.hbm [resolvable:$true] %s2095_s24 }
  0x1e   : > { %584 = vmatpush.msra.mxu3 %v563_v8  ;;  %v2025_v18 = vld [vmem:[%s3075_s2] ss:$0 sm:$0xff]  ;;  %s2097_s26 = scalar_lea.hbm %s2096_s24, 8  ;;  %p2102_p0 = scmp.lt.s32.totalorder %s2096_s24, %s3088_s15 }
  0x1f   : > { %520 = vmatpush.msra.mxu0 %v493_v5  ;;  %v2027_v22 = vld [vmem:[%s3079_s6] ss:$0 sm:$0xff]  ;;  %p2098_p11 = scmp.ne.s32.totalorder %s2096_s24, %s2097_s26  ;;  %p2103_p1 = scmp.lt.s32.totalorder %s2101_s27, %s2097_s26 }
  0x20   : > { %1821 = vmatmul.msk.f32.vlgmr.msra.gmra.mxu0 %vm501_vm0, %v2309_v9  ;;  %585 = vmatpush.msra.mxu3 %v562_v10  ;;  %v683_v36 = vld [vmem:[%s3082_s9] sm:$0xff] }
  0x21   : > { %669 = vmatpush.msrb.mxu0 %v652_v7  ;;  %1822 = vmatmul.msk.f32.vlgmr.msra.gmra.mxu3 %vm501_vm0, %v2309_v9  ;;  %v2028_v59 = vld [vmem:[%s3080_s7] ss:$0 sm:$0xff]  ;;  %p2099_p12 = pnand %p2098_p11, %p2267_p5  ;;  %p2104_p2 = por %p2103_p1, %p2102_p0 }
  0x22   : > { %702 = vmatpush.msrb.mxu3 %v684_v34  ;;  %v2029_v2 = vld [vmem:[#allocation2] ss:$0 sm:$0xff] }
  0x23   : > { %670 = vmatpush.msrb.mxu0 %v651_v11  ;;  %p2100_p13 = pneg %p2099_p12 }
  0x24   : > { %703 = vmatpush.msrb.mxu3 %v683_v36 }
  0x25   : > { %671 = vmatpush.msrb.mxu0 %v650_v12  ;;  %p2105_p3 = pnand %p2104_p2, %p2100_p13 }
  0x27   : > { %672 = vmatpush.msrb.mxu0 %v649_v13 }
  0x28   : > { %1824 = vmatmul.msk.f32.vlgmr.msrb.gmra.mxu0 %vm501_vm0, %v2309_v9 }
  0x9d   : > { %v522_v14 = vpop.f32.mrf.mxu0 }
  0x9e   : > { %v523_v20 = vadd.f32 %v2025_v18, %v522_v14 }
  0xa0   : > { %v526_v21 = vsel %vm525_vm1, %v523_v20, -inf }
  0xa4   : > { %v587_v23 = vpop.f32.mrf.mxu3 }
  0xa5   : > { %v674_v16 = vpop.f32.mrf.mxu0  ;;  %v588_v24 = vadd.f32 %v2027_v22, %v587_v23 }
  0xa6   : > { %v675_v17 = vadd.f32 %v2026_v15, %v674_v16 }
  0xa7   : > { %v591_v25 = vmul.f32 0.70710677, %v588_v24  ;;  %v590_v56 = vmul.f32 0.5, %v588_v24 }
  0xa8   : > { %v677_v19 = vsel %vm525_vm1, %v675_v17, -inf }
  0xa9   : > { %678 = vmax.xlane.f32.xlu0 %v677_v19  ;;  %v592_v26 = vand.u32 2147483647, %v591_v25  ;;  %vm611_vm2 = vcmp.ge.f32.partialorder %v591_v25, 0.0 }
  0xab   : > { %v593_v27 = vmul.f32 0.3275911, %v592_v26  ;;  %v605_v35 = vsub.f32 0.0, %v592_v26 }
  0xad   : > { %v594_v28 = vadd.f32 1.0, %v593_v27  ;;  %v606_v38 = vmul.f32 %v605_v35, %v592_v26 }
  0xaf   : > { %2030 = vrcp.f32 %v594_v28  ;;  %v607_v40 = vmul.f32 1.442695, %v606_v38 }
  0xb1   : > { %527 = vmax.xlane.f32.xlu0 %v526_v21  ;;  %2032 = vpow2.f32 %v607_v40 }
  0xb5   : > { %v2031_v29 = vpop.eup %2030 }
  0xb6   : > { %v596_v30 = vmul.f32 1.0614054, %v2031_v29 }
  0xb7   : > { %v2033_v44 = vpop.eup %2032 }
  0xb8   : > { %v597_v31 = vadd.f32 -1.4531521, %v596_v30 }
  0xba   : > { %v598_v32 = vmul.f32 %v2031_v29, %v597_v31 }
  0xbc   : > { %v599_v33 = vadd.f32 1.4214138, %v598_v32 }
  0xbe   : > { %v600_v37 = vmul.f32 %v2031_v29, %v599_v33 }
  0xc0   : > { %v601_v39 = vadd.f32 -0.28449672, %v600_v37 }
  0xc2   : > { %v602_v41 = vmul.f32 %v2031_v29, %v601_v39 }
  0xc4   : > { %v603_v42 = vadd.f32 0.2548296, %v602_v41 }
  0xc6   : > { %v604_v43 = vmul.f32 %v2031_v29, %v603_v42 }
  0xc8   : > { %v609_v45 = vmul.f32 %v2033_v44, %v604_v43 }
  0xca   : > { %v610_v49 = vsub.f32 1.0, %v609_v45 }
  0xcc   : > { %v612_v50 = vsub.f32 0.0, %v610_v49 }
  0xce   : > { %v613_v55 = vsel %vm611_vm2, %v610_v49, %v612_v50 }
  0xcf   : > { %v614_v57 = vadd.f32 1.0, %v613_v55 }
  0xd1   : > { %v615_v58 = vmul.f32 %v614_v57, %v590_v56 }
  0xd3   : > { %v620_v62 = vmul.f32 %v2028_v59, %v615_v58 }
  0xd5   : > { %v622_v63 = vsel %vm621_vm3, %v620_v62, 0.0 }
 0x11c   : > { %v679_v46 = vpop.xlane.xlu0 %678 }
 0x11d   : > { %v680_v47 = vsub.f32 %v675_v17, %v679_v46 }
 0x11f   : > { %v681_v48 = vmul.f32 1.442695, %v680_v47 }
 0x121   : > { %2034 = vpow2.f32 %v681_v48 }
 0x124   : > { %v528_v51 = vpop.xlane.xlu0 %527 }
 0x125   : > { %v529_v52 = vsub.f32 %v523_v20, %v528_v51 }
 0x127   : > { %v2346_v53 = vpop.eup %2034  ;;  %v530_v54 = vmul.f32 1.442695, %v529_v52 }
 0x128   : > { %1825 = vmatmul.msk.f32.vlgmr.msrb.gmra.mxu3 %vm525_vm1, %v2346_v53 }
 0x129   : > { %2036 = vpow2.f32 %v530_v54 }
 0x12f   : > { %v2037_v60 = vpop.eup %2036 }
 0x130   : > { %v532_v61 = vsel %vm525_vm1, %v2037_v60, 0.0 }
 0x131   : > { %533 = vadd.xlane.f32.xlu1 %v532_v61 }
 0x139   : > { %623 = vadd.xlane.f32.xlu1 %v622_v63 }
 0x1a4   : > { %v534_v1 = vpop.xlane.xlu1 %533 }
 0x1a5   : > { %2038 = vrcp.f32 %v534_v1  ;;  %v546_v8 = vand.u32 2147483648, %v534_v1  ;;  %v544_v12 = vand.u32 2147483647, %v534_v1  ;;  %vm540_vm5 = vweird.f32 %v534_v1 }
 0x1a7   : > { %v547_v14 = vor.u32 1.1754944e-38, %v546_v8  ;;  %vm545_vm7 = vcmp.eq.f32.partialorder %v544_v12, 8.507059e+37  ;;  %v757_v8 = vlaneseq }
 0x1ab   : > { %v2039_v3 = vpop.eup %2038  ;;  %v705_v37 = vpop.f32.mrf.mxu3 }
 0x1ac   : > { %v536_v4 = vmul.f32 %v2039_v3, %v534_v1  ;;  %v624_v5 = vpop.xlane.xlu1 %623  ;;  %vm541_vm4 = vweird.f32 %v2039_v3  ;;  %v719_v43 = vand.u32 2147483648, %v705_v37  ;;  %vm713_vm14 = vweird.f32 %v705_v37 }
 0x1ad   : > { %v629_v6 = vadd.f32 %v2029_v2, %v624_v5  ;;  %vm542_vm6 = vmor %vm540_vm5, %vm541_vm4  ;;  %v717_v44 = vand.u32 2147483647, %v705_v37 }
 0x1ae   : > { %v537_v7 = vsub.f32 1.0, %v536_v4  ;;  %v720_v46 = vor.u32 1.1754944e-38, %v719_v43 }
 0x1af   : > { %v1823_v10 = vmul.f32 -1.442695, %v629_v6  ;;  %vm718_vm2 = vcmp.eq.f32.partialorder %v717_v44, 8.507059e+37 }
 0x1b0   : > { %v538_v11 = vmul.f32 %v2039_v3, %v537_v7 }
 0x1b1   : > { %2040 = vpow2.f32 %v1823_v10  ;;  %v758_v10 = vand.u32 127, %v757_v8  ;;  %v969_v8 = vld [vmem:[%s3087_s14 + $0x48] sm:$0xff] }
 0x1b2   : > { %v539_v13 = vadd.f32 %v2039_v3, %v538_v11 }
 0x1b3   : > { %v2361_v11 = vcvt.s32.f32 %v758_v10  ;;  %v986_v10 = vld [vmem:[%s3087_s14 + $0xd0] sm:$0xff] }
 0x1b4   : > { %v543_v15 = vsel %vm542_vm6, %v2039_v3, %v539_v13 }
 0x1b5   : > { %v548_v16 = vsel %vm545_vm7, %v547_v14, %v543_v15 }
 0x1b6   : > { %v549_v17 = vmul.f32 4.0, %v548_v16 }
 0x1b7   : > { %v2041_v18 = vpop.eup %2040 }
 0x1b8   : > { %v633_v19 = vadd.f32 1.0, %v2041_v18  ;;  %v550_v20 = vmul.f32 %v2037_v60, %v549_v17 }
 0x1ba   : > { %2042 = vrcp.f32 %v633_v19  ;;  %v551_v21 = vsel %vm525_vm1, %v550_v20, -inf  ;;  %v645_v24 = vand.u32 2147483648, %v633_v19  ;;  %vm639_vm8 = vweird.f32 %v633_v19 }
 0x1bb   : > { %552 = vmax.xlane.f32.xlu2 %v551_v21  ;;  %v643_v26 = vand.u32 2147483647, %v633_v19  ;;  %2044 = vrcp.f32 %v705_v37 }
 0x1bc   : > { %v646_v28 = vor.u32 1.1754944e-38, %v645_v24 }
 0x1bd   : > { %vm644_vm11 = vcmp.eq.f32.partialorder %v643_v26, 8.507059e+37 }
 0x1c0   : > { %v2043_v22 = vpop.eup %2042 }
 0x1c1   : > { %v635_v23 = vmul.f32 %v2043_v22, %v633_v19  ;;  %vm640_vm9 = vweird.f32 %v2043_v22  ;;  %v2045_v38 = vpop.eup %2044 }
 0x1c2   : > { %vm641_vm10 = vmor %vm639_vm8, %vm640_vm9  ;;  %v709_v39 = vmul.f32 %v2045_v38, %v705_v37  ;;  %vm714_vm13 = vweird.f32 %v2045_v38  ;;  %v807_v37 = vld [vmem:[%s3084_s11 + $0x10] sm:$0xff] }
 0x1c3   : > { %v636_v25 = vsub.f32 1.0, %v635_v23  ;;  %vm715_vm15 = vmor %vm713_vm14, %vm714_vm13 }
 0x1c4   : > { %v710_v40 = vsub.f32 1.0, %v709_v39  ;;  %v808_v39 = vld [vmem:[%s3084_s11 + $0x18] sm:$0xff] }
 0x1c5   : > { %v637_v27 = vmul.f32 %v2043_v22, %v636_v25 }
 0x1c6   : > { %v711_v41 = vmul.f32 %v2045_v38, %v710_v40  ;;  %v914_v40 = vld [vmem:[%s3086_s13 + $0x18] sm:$0xff] }
 0x1c7   : > { %v638_v29 = vadd.f32 %v2043_v22, %v637_v27  ;;  %952 = vmatpush.msra.mxu2 %v914_v40 }
 0x1c8   : > { %v712_v42 = vadd.f32 %v2045_v38, %v711_v41  ;;  %v805_v41 = vld [vmem:[%s3084_s11] sm:$0xff] }
 0x1c9   : > { %v642_v30 = vsel %vm641_vm10, %v2043_v22, %v638_v29 }
 0x1ca   : > { %v647_v31 = vsel %vm644_vm11, %v646_v28, %v642_v30  ;;  %v716_v45 = vsel %vm715_vm15, %v2045_v38, %v712_v42  ;;  %v913_v38 = vld [vmem:[%s3086_s13 + $0x10] sm:$0xff]  ;;  %v806_v42 = vld [vmem:[%s3084_s11 + $0x8] sm:$0xff] }
 0x1cb   : > { %v729_v32 = vsub.f32 1.0, %v647_v31  ;;  %v721_v47 = vsel %vm718_vm2, %v720_v46, %v716_v45  ;;  %932 = vmatpush.msra.mxu1 %v913_v38  ;;  %v911_v46 = vld [vmem:[%s3086_s13] sm:$0xff] }
 0x1cc   : > { %v722_v49 = vmul.f32 %v2346_v53, %v721_v47  ;;  %v912_v47 = vld [vmem:[%s3086_s13 + $0x8] sm:$0xff] }
 0x1cd   : > { %v730_v33 = vmul.f32 0.25, %v729_v32  ;;  %933 = vmatpush.msra.mxu1 %v911_v46  ;;  %953 = vmatpush.msra.mxu2 %v912_v47 }
 0x1cf   : > { %733 = vperm.xlu1 %2023, %v730_v33   ;;  %v811_v33 = vld [vmem:[%s3084_s11 + $0x30] sm:$0xff] }
 0x1d0   : > { %831 = vmatpush.msra.mxu3 %v811_v33 }
 0x1d3   : > { %725 = vperm.xlu2 %2022, %v647_v31  }
 0x22e   : > { %v553_v34 = vpop.xlane.xlu2 %552 }
 0x22f   : > { %vm554_vm12 = vcmp.eq.f32.partialorder %v550_v20, %v553_v34  ;;  %v809_v34 = vld [vmem:[%s3084_s11 + $0x20] sm:$0xff] }
 0x230   : > { %v556_v35 = vsel %vm554_vm12, -1.0, %v550_v20  ;;  %v555_v54 = vsel %vm554_vm12, %v550_v20, 0.0  ;;  %832 = vmatpush.msra.mxu3 %v809_v34 }
 0x231   : > { %v557_v36 = vsel %vm525_vm1, %v556_v35, -inf }
 0x232   : > { %558 = vmax.xlane.f32.xlu0 %v557_v36  ;;  %v810_v36 = vld [vmem:[%s3084_s11 + $0x28] sm:$0xff]  ;;  %833 = vmatpush.msra.mxu3 %v807_v37 }
 0x234   : > { %834 = vmatpush.msra.mxu3 %v805_v41 }
 0x235   : > { %1826 = vmatmul.msk.f32.vlgmr.msra.gmra.mxu3 %vm501_vm0, %v2309_v9 }
 0x236   : > { %v726_v48 = vpop.permute.xlu2 %725 }
 0x237   : > { %v728_v51 = vmul.f32 %v726_v48, %v722_v49  ;;  %v1837_v48 = vld [vmem:[%s3084_s11 + $0x70] sm:$0xff]  ;;  %v1835_v49 = vld [vmem:[%s3084_s11 + $0x60] sm:$0xff] }
 0x238   : > { %1080 = vmatpush.msrb.mxu2 %v1837_v48 }
 0x23a   : > { %1081 = vmatpush.msrb.mxu2 %v1835_v49 }
 0x241   : > { %v734_v50 = vpop.permute.xlu1 %733 }
 0x242   : > { %v736_v55 = vadd.f32 %v734_v50, %v728_v51  ;;  %v804_v50 = vld [vmem:[%s3083_s10 + $0x8] sm:$0xff]  ;;  %v803_v51 = vld [vmem:[%s3083_s10] sm:$0xff] }
 0x243   : > { %1046 = vmatpush.msrb.mxu1 %v804_v50 }
 0x245   : > { %1047 = vmatpush.msrb.mxu1 %v803_v51 }
 0x2a5   : > { %v559_v52 = vpop.xlane.xlu0 %558 }
 0x2a6   : > { %vm560_vm3 = vcmp.eq.f32.partialorder %v556_v35, %v559_v52  ;;  %v1833_v52 = vld [vmem:[%s3084_s11 + $0x50] sm:$0xff] }
 0x2a7   : > { %v561_v56 = vsel %vm560_vm3, %v556_v35, %v555_v54  ;;  %v812_v35 = vld [vmem:[%s3084_s11 + $0x38] sm:$0xff]  ;;  %v1831_v54 = vld [vmem:[%s3084_s11 + $0x40] sm:$0xff]  ;;  %1082 = vmatpush.msrb.mxu2 %v1833_v52 }
 0x2a8   : > { %v737_v57 = vmul.f32 %v736_v55, %v561_v56  ;;  %851 = vmatpush.msra.mxu0 %v812_v35  ;;  %v975_v55 = vld [vmem:[%s3087_s14 + $0x78] sm:$0xff]  ;;  %v974_v56 = vld [vmem:[%s3087_s14 + $0x70] sm:$0xff] }
 0x2a9   : > { %1083 = vmatpush.msrb.mxu2 %v1831_v54  ;;  %992 = vmatpush.msrb.mxu3 %v975_v55 }
 0x2aa   : > { %v738_v58 = vsel %vm525_vm1, %v737_v57, 0.0  ;;  %852 = vmatpush.msra.mxu0 %v810_v36 }
 0x2ab   : > { %739 = vadd.xlane.f32.xlu0 %v738_v58  ;;  %v973_v58 = vld [vmem:[%s3087_s14 + $0x68] sm:$0xff]  ;;  %993 = vmatpush.msrb.mxu3 %v974_v56 }
 0x2ac   : > { %853 = vmatpush.msra.mxu0 %v808_v39 }
 0x2ad   : > { %994 = vmatpush.msrb.mxu3 %v973_v58 }
 0x2ae   : > { %854 = vmatpush.msra.mxu0 %v806_v42 }
 0x2af   : > { %1827 = vmatmul.msk.f32.vlgmr.msra.gmra.mxu0 %vm501_vm0, %v2309_v9 }
 0x31e   : > { %v740_v59 = vpop.xlane.xlu0 %739 }
 0x31f   : > { %v741_v60 = vadd.f32 1e-09, %v740_v59  ;;  %v990_v59 = vld [vmem:[%s3087_s14 + $0xf0] sm:$0xff] }
 0x321   : > { %2046 = vrcp.f32 %v741_v60  ;;  %v753_v0 = vand.u32 2147483648, %v741_v60  ;;  %v751_v1 = vand.u32 2147483647, %v741_v60  ;;  %vm747_vm5 = vweird.f32 %v741_v60 }
 0x323   : > { %v754_v3 = vor.u32 1.1754944e-38, %v753_v0  ;;  %vm752_vm7 = vcmp.eq.f32.partialorder %v751_v1, 8.507059e+37  ;;  %v1844_v0 = vld [vmem:[%s3086_s13 + $0x30] sm:$0xff]  ;;  %v971_v1 = vld [vmem:[%s3087_s14 + $0x58] sm:$0xff] }
 0x327   : > { %v2047_v61 = vpop.eup %2046 }
 0x328   : > { %v743_v62 = vmul.f32 %v2047_v61, %v741_v60  ;;  %vm748_vm4 = vweird.f32 %v2047_v61  ;;  %v989_v60 = vld [vmem:[%s3087_s14 + $0xe8] sm:$0xff] }
 0x329   : > { %vm749_vm6 = vmor %vm747_vm5, %vm748_vm4 }
 0x32a   : > { %v744_v63 = vsub.f32 1.0, %v743_v62 }
 0x32c   : > { %v745_v53 = vmul.f32 %v2047_v61, %v744_v63  ;;  %v1838_v63 = vld [vmem:[%s3084_s11 + $0x78] sm:$0xff] }
 0x32e   : > { %v746_v2 = vadd.f32 %v2047_v61, %v745_v53 }
 0x330   : > { %v750_v4 = vsel %vm749_vm6, %v2047_v61, %v746_v2  ;;  %v972_v61 = vld [vmem:[%s3087_s14 + $0x60] sm:$0xff] }
 0x331   : > { %v755_v5 = vsel %vm752_vm7, %v754_v3, %v750_v4  ;;  %995 = vmatpush.msrb.mxu3 %v972_v61  ;;  %v988_v2 = vld [vmem:[%s3087_s14 + $0xe0] sm:$0xff]  ;;  %v1836_v3 = vld [vmem:[%s3084_s11 + $0x68] sm:$0xff] }
 0x332   : > { %v756_v6 = vmul.f32 %v755_v5, %v737_v57  ;;  %v991_v57 = vld [vmem:[%s3087_s14 + $0xf8] sm:$0xff]  ;;  %v1842_v4 = vld [vmem:[%s3086_s13 + $0x20] sm:$0xff]  ;;  %v970_v5 = vld [vmem:[%s3087_s14 + $0x50] sm:$0xff] }
 0x333   : > { %1012 = vmatpush.msrb.mxu0 %v991_v57  ;;  %996 = vmatpush.msrb.mxu3 %v971_v1  ;;  %v961_v61 = vld [vmem:[%s3087_s14 + $0x8] sm:$0xff]  ;;  %v979_v1 = vld [vmem:[%s3087_s14 + $0x98] sm:$0xff] }
 0x334   : > { %v760_v7 = vsel %vm525_vm1, %v756_v6, -inf }
 0x335   : > { %761 = vmax.xlane.f32.xlu0 %v760_v7  ;;  %1013 = vmatpush.msrb.mxu0 %v990_v59  ;;  %v1834_v7 = vld [vmem:[%s3084_s11 + $0x58] sm:$0xff] }
 0x336   : > { %997 = vmatpush.msrb.mxu3 %v970_v5  ;;  %v1886_v5 = vld [vmem:[%s3084_s11 + $0xb0] sm:$0xff] }
 0x337   : > { %1014 = vmatpush.msrb.mxu0 %v989_v60 }
 0x338   : > { %998 = vmatpush.msrb.mxu3 %v969_v8  ;;  %v977_v8 = vld [vmem:[%s3087_s14 + $0x88] sm:$0xff] }
 0x339   : > { %1015 = vmatpush.msrb.mxu0 %v988_v2 }
 0x3a8   : > { %v762_v12 = vpop.xlane.xlu0 %761 }
 0x3a9   : > { %vm763_vm8 = vcmp.eq.f32.partialorder %v756_v6, %v762_v12  ;;  %v1845_v12 = vld [vmem:[%s3086_s13 + $0x38] sm:$0xff] }
 0x3aa   : > { %v764_v13 = vsel %vm763_vm8, %v2361_v11, 1e+09 }
 0x3ab   : > { %v765_v14 = vsel %vm525_vm1, %v764_v13, inf  ;;  %v968_v13 = vld [vmem:[%s3087_s14 + $0x40] sm:$0xff] }
 0x3ac   : > { %766 = vmin.xlane.f32.xlu2 %v765_v14  ;;  %v985_v14 = vld [vmem:[%s3087_s14 + $0xc8] sm:$0xff]  ;;  %999 = vmatpush.msrb.mxu3 %v968_v13 }
 0x41f   : > { %v767_v15 = vpop.xlane.xlu2 %766 }
 0x420   : > { %vm768_vm9 = vcmp.eq.f32.partialorder %v2361_v11, %v767_v15  ;;  %v1843_v15 = vld [vmem:[%s3086_s13 + $0x28] sm:$0xff] }
 0x421   : > { %v770_v16 = vsel %vm768_vm9, -1.0, %v756_v6  ;;  %v769_v22 = vsel %vm768_vm9, %v756_v6, 0.0  ;;  %v987_v6 = vld [vmem:[%s3087_s14 + $0xd8] sm:$0xff] }
 0x422   : > { %v771_v17 = vsel %vm525_vm1, %v770_v16, -inf  ;;  %1016 = vmatpush.msrb.mxu0 %v987_v6 }
 0x423   : > { %772 = vmax.xlane.f32.xlu0 %v771_v17  ;;  %v984_v17 = vld [vmem:[%s3087_s14 + $0xc0] sm:$0xff] }
 0x424   : > { %1017 = vmatpush.msrb.mxu0 %v986_v10  ;;  %v1884_v10 = vld [vmem:[%s3084_s11 + $0xa0] sm:$0xff] }
 0x426   : > { %1018 = vmatpush.msrb.mxu0 %v985_v14  ;;  %v1882_v14 = vld [vmem:[%s3084_s11 + $0x90] sm:$0xff] }
 0x428   : > { %1019 = vmatpush.msrb.mxu0 %v984_v17 }
 0x496   : > { %v773_v18 = vpop.xlane.xlu0 %772 }
 0x497   : > { %vm774_vm10 = vcmp.eq.f32.partialorder %v770_v16, %v773_v18  ;;  %v966_v18 = vld [vmem:[%s3087_s14 + $0x30] sm:$0xff] }
 0x498   : > { %v775_v19 = vsel %vm774_vm10, %v2361_v11, 1e+09 }
 0x499   : > { %v776_v20 = vsel %vm525_vm1, %v775_v19, inf  ;;  %v983_v19 = vld [vmem:[%s3087_s14 + $0xb8] sm:$0xff] }
 0x49a   : > { %777 = vmin.xlane.f32.xlu1 %v776_v20  ;;  %v965_v20 = vld [vmem:[%s3087_s14 + $0x28] sm:$0xff]  ;;  %1020 = vmatpush.msrb.mxu0 %v983_v19 }
 0x50d   : > { %v778_v21 = vpop.xlane.xlu1 %777 }
 0x50e   : > { %vm779_vm11 = vcmp.eq.f32.partialorder %v2361_v11, %v778_v21  ;;  %v964_v21 = vld [vmem:[%s3087_s14 + $0x20] sm:$0xff] }
 0x50f   : > { %v780_v23 = vsel %vm779_vm11, %v770_v16, %v769_v22  ;;  %v781_v24 = vsel %vm779_vm11, -1.0, %v770_v16  ;;  %v967_v16 = vld [vmem:[%s3087_s14 + $0x38] sm:$0xff]  ;;  %v982_v22 = vld [vmem:[%s3087_s14 + $0xb0] sm:$0xff] }
 0x510   : > { %v782_v25 = vsel %vm525_vm1, %v781_v24, -inf  ;;  %1000 = vmatpush.msrb.mxu3 %v967_v16  ;;  %1021 = vmatpush.msrb.mxu0 %v982_v22  ;;  %v1887_v16 = vld [vmem:[%s3084_s11 + $0xb8] sm:$0xff] }
 0x511   : > { %783 = vmax.xlane.f32.xlu0 %v782_v25  ;;  %v962_v25 = vld [vmem:[%s3087_s14 + $0x10] sm:$0xff]  ;;  %v1883_v22 = vld [vmem:[%s3084_s11 + $0x98] sm:$0xff] }
 0x512   : > { %1001 = vmatpush.msrb.mxu3 %v966_v18  ;;  %v1885_v18 = vld [vmem:[%s3084_s11 + $0xa8] sm:$0xff] }
 0x514   : > { %1002 = vmatpush.msrb.mxu3 %v965_v20 }
 0x516   : > { %1003 = vmatpush.msrb.mxu3 %v964_v21 }
 0x584   : > { %v784_v26 = vpop.xlane.xlu0 %783 }
 0x585   : > { %vm785_vm12 = vcmp.eq.f32.partialorder %v781_v24, %v784_v26  ;;  %v813_v26 = vld [vmem:[%s3085_s12] sm:$0x3] }
 0x586   : > { %v786_v27 = vsel %vm785_vm12, %v2361_v11, 1e+09 }
 0x587   : > { %v787_v28 = vsel %vm525_vm1, %v786_v27, inf  ;;  %v815_v27 = vperm.slane %v813_v26, 0 }
 0x588   : > { %788 = vmin.xlane.f32.xlu0 %v787_v28  ;;  %v836_v28 = vpop.f32.mrf.mxu3 }
 0x5fb   : > { %v789_v29 = vpop.xlane.xlu0 %788 }
 0x5fc   : > { %vm790_vm13 = vcmp.eq.f32.partialorder %v2361_v11, %v789_v29  ;;  %v2562_v29 = vadd.f32 %v836_v28, %v815_v27 }
 0x5fd   : > { %v2374_v30 = vsel %vm790_vm13, %v781_v24, %v780_v23  ;;  %v2376_v31 = vsel %vm790_vm13, -1.0, %v781_v24  ;;  %v963_v23 = vld [vmem:[%s3087_s14 + $0x18] sm:$0xff]  ;;  %v981_v24 = vld [vmem:[%s3087_s14 + $0xa8] sm:$0xff] }
 0x5fe   : > { %v793_v32 = vsel %vm525_vm1, %v2376_v31, -inf  ;;  %1004 = vmatpush.msrb.mxu3 %v963_v23  ;;  %1022 = vmatpush.msrb.mxu0 %v981_v24  ;;  %v1881_v24 = vld [vmem:[%s3084_s11 + $0x88] sm:$0xff] }
 0x5ff   : > { %794 = vmax.xlane.f32.xlu0 %v793_v32  ;;  %v2565_v32 = vmul.f32 0.70710677, %v2562_v29 }
 0x600   : > { %1005 = vmatpush.msrb.mxu3 %v962_v25 }
 0x601   : > { %v863_v34 = vand.u32 2147483647, %v2565_v32  ;;  %vm901_vm2 = vcmp.ge.f32.partialorder %v2565_v32, 0.0  ;;  %v1893_v32 = vld [vmem:[%s3086_s13 + $0x50] sm:$0xff] }
 0x602   : > { %1006 = vmatpush.msrb.mxu3 %v961_v61 }
 0x603   : > { %v865_v36 = vmul.f32 0.3275911, %v863_v34  ;;  %v889_v50 = vsub.f32 0.0, %v863_v34 }
 0x605   : > { %v867_v38 = vadd.f32 1.0, %v865_v36  ;;  %v891_v54 = vmul.f32 %v889_v50, %v863_v34 }
 0x607   : > { %2048 = vrcp.f32 %v867_v38  ;;  %v893_v58 = vmul.f32 1.442695, %v891_v54  ;;  %v1876_v54 = vld [vmem:[%s3087_s14 + $0x1e0] sm:$0xff] }
 0x60d   : > { %v2049_v41 = vpop.eup %2048 }
 0x60e   : > { %v871_v42 = vmul.f32 1.0614054, %v2049_v41 }
 0x672   : > { %v795_v43 = vpop.xlane.xlu0 %794 }
 0x673   : > { %vm796_vm14 = vcmp.eq.f32.partialorder %v2376_v31, %v795_v43 }
 0x674   : > { %v797_v44 = vsel %vm796_vm14, %v2361_v11, 1e+09 }
 0x675   : > { %v798_v45 = vsel %vm525_vm1, %v797_v44, inf  ;;  %v873_v44 = vadd.f32 -1.4531521, %v871_v42  ;;  %v1891_v42 = vld [vmem:[%s3086_s13 + $0x40] sm:$0xff] }
 0x676   : > { %799 = vmin.xlane.f32.xlu0 %v798_v45 }
 0x677   : > { %v875_v46 = vmul.f32 %v2049_v41, %v873_v44  ;;  %v1878_v44 = vld [vmem:[%s3087_s14 + $0x1f0] sm:$0xff] }
 0x679   : > { %v877_v48 = vadd.f32 1.4214138, %v875_v46  ;;  %v1860_v46 = vld [vmem:[%s3087_s14 + $0x160] sm:$0xff] }
 0x67b   : > { %v879_v51 = vmul.f32 %v2049_v41, %v877_v48 }
 0x67d   : > { %v881_v55 = vadd.f32 -0.28449672, %v879_v51  ;;  %v1839_v51 = vld [vmem:[%s3085_s12 + $0x2] sm:$0x3] }
 0x67e   : > { %v1065_v61 = vperm.slane %v1839_v51, 1 }
 0x67f   : > { %v883_v59 = vmul.f32 %v2049_v41, %v881_v55  ;;  %v1892_v55 = vld [vmem:[%s3086_s13 + $0x48] sm:$0xff] }
 0x681   : > { %v885_v2 = vadd.f32 0.2548296, %v883_v59  ;;  %v1857_v59 = vld [vmem:[%s3087_s14 + $0x148] sm:$0xff] }
 0x6e9   : > { %v800_v62 = vpop.xlane.xlu0 %799 }
 0x6ea   : > { %vm801_vm15 = vcmp.eq.f32.partialorder %v2361_v11, %v800_v62  ;;  %v1832_v11 = vld [vmem:[%s3084_s11 + $0x48] sm:$0xff]  ;;  %v980_v62 = vld [vmem:[%s3087_s14 + $0xa0] sm:$0xff] }
 0x6eb   : > { %v2471_v53 = vsel %vm801_vm15, %v2376_v31, %v2374_v30  ;;  %v816_v30 = vperm.slane %v813_v26, 1  ;;  %v856_v31 = vpop.f32.mrf.mxu0  ;;  %1023 = vmatpush.msrb.mxu0 %v980_v62 }
 0x6ec   : > { %1828 = vmatmul.msk.f32.vlgmr.msra.gmra.mxu1 %vm525_vm1, %v2471_v53  ;;  %1829 = vmatmul.msk.f32.vlgmr.msra.gmra.mxu2 %vm525_vm1, %v2471_v53 }
 0x6ed   : > { %1100 = vmatpush.msra.mxu1 %v1838_v63  ;;  %1179 = vmatpush.msra.mxu2 %v1844_v0  ;;  %v2567_v33 = vadd.f32 %v856_v31, %v816_v30  ;;  %v960_v0 = vld [vmem:[%s3087_s14] sm:$0xff]  ;;  %v859_v30 = vmul.f32 0.5, %v2562_v29  ;;  %v1862_v29 = vld [vmem:[%s3087_s14 + $0x170] sm:$0xff] }
 0x6ee   : > { %1007 = vmatpush.msrb.mxu3 %v960_v0  ;;  %1024 = vmatpush.msrb.mxu0 %v979_v1  ;;  %v1873_v0 = vld [vmem:[%s3087_s14 + $0x1c8] sm:$0xff] }
 0x6ef   : > { %1101 = vmatpush.msra.mxu1 %v1836_v3  ;;  %1180 = vmatpush.msra.mxu2 %v1842_v4  ;;  %v2571_v35 = vmul.f32 0.70710677, %v2567_v33  ;;  %v978_v4 = vld [vmem:[%s3087_s14 + $0x90] sm:$0xff] }
 0x6f0   : > { %1309 = vmatpush.msra.mxu3 %v1886_v5  ;;  %1025 = vmatpush.msrb.mxu0 %v978_v4  ;;  %v1872_v4 = vld [vmem:[%s3087_s14 + $0x1c0] sm:$0xff] }
 0x6f1   : > { %1102 = vmatpush.msra.mxu1 %v1834_v7  ;;  %v864_v37 = vand.u32 2147483647, %v2571_v35  ;;  %v887_v7 = vmul.f32 %v2049_v41, %v885_v2  ;;  %vm902_vm3 = vcmp.ge.f32.partialorder %v2571_v35, 0.0 }
 0x6f2   : > { %1026 = vmatpush.msrb.mxu0 %v977_v8  ;;  %1310 = vmatpush.msra.mxu3 %v1884_v10  ;;  %v1871_v8 = vld [vmem:[%s3087_s14 + $0x1b8] sm:$0xff] }
 0x6f3   : > { %1103 = vmatpush.msra.mxu1 %v1832_v11  ;;  %v866_v39 = vmul.f32 0.3275911, %v864_v37  ;;  %v890_v56 = vsub.f32 0.0, %v864_v37 }
 0x6f4   : > { %1830 = vmatmul.msk.f32.vlgmr.msrb.gmra.mxu1 %vm525_vm1, %v2471_v53  ;;  %1840 = vmatmul.msk.f32.vlgmr.msrb.gmra.mxu2 %vm501_vm0, %v2309_v9 }
 0x6f5   : > { %1199 = vmatpush.msrb.mxu1 %v1845_v12  ;;  %v868_v40 = vadd.f32 1.0, %v866_v39  ;;  %v892_v60 = vmul.f32 %v890_v56, %v864_v37  ;;  %v976_v12 = vld [vmem:[%s3087_s14 + $0x80] sm:$0xff]  ;;  %1311 = vmatpush.msra.mxu3 %v1882_v14  ;;  %v860_v37 = vmul.f32 0.5, %v2567_v33  ;;  %v1879_v33 = vld [vmem:[%s3087_s14 + $0x1f8] sm:$0xff]  ;;  %v1858_v56 = vld [vmem:[%s3087_s14 + $0x150] sm:$0xff] }
 0x6f6   : > { %1027 = vmatpush.msrb.mxu0 %v976_v12  ;;  %v1870_v12 = vld [vmem:[%s3087_s14 + $0x1b0] sm:$0xff] }
 0x6f7   : > { %1200 = vmatpush.msrb.mxu1 %v1843_v15  ;;  %2050 = vrcp.f32 %v868_v40  ;;  %v895_v3 = vmul.f32 1.442695, %v892_v60  ;;  %v1880_v15 = vld [vmem:[%s3084_s11 + $0x80] sm:$0xff]  ;;  %v1863_v40 = vld [vmem:[%s3087_s14 + $0x178] sm:$0xff]  ;;  %v1874_v60 = vld [vmem:[%s3087_s14 + $0x1d0] sm:$0xff] }
 0x6f8   : > { %2052 = vpow2.f32 %v893_v58  ;;  %1329 = vmatpush.msra.mxu0 %v1887_v16  ;;  %1312 = vmatpush.msra.mxu3 %v1880_v15  ;;  %v1064_v58 = vperm.slane %v1839_v51, 0  ;;  %v1852_v15 = vld [vmem:[%s3087_s14 + $0x120] sm:$0xff]  ;;  %v1869_v16 = vld [vmem:[%s3087_s14 + $0x1a8] sm:$0xff] }
 0x6f9   : > { %2054 = vpow2.f32 %v895_v3  ;;  %1240 = vmatpush.msrb.mxu2 %v1863_v40  ;;  %v1855_v3 = vld [vmem:[%s3087_s14 + $0x138] sm:$0xff]  ;;  %v1933_v40 = vld [vmem:[%s3084_s11 + $0xe0] sm:$0xff]  ;;  %v1930_v51 = vld [vmem:[%s3084_s11 + $0xc8] sm:$0xff] }
 0x6fa   : > { %1330 = vmatpush.msra.mxu0 %v1885_v18 }
 0x6fb   : > { %1241 = vmatpush.msrb.mxu2 %v1862_v29 }
 0x6fc   : > { %1841 = vmatmul.msk.f32.vlgmr.msra.gmra.mxu1 %vm501_vm0, %v2309_v9  ;;  %1846 = vmatmul.msk.f32.vlgmr.msra.gmra.mxu2 %vm525_vm1, %v2471_v53 }
 0x6fd   : > { %v2051_v43 = vpop.eup %2050  ;;  %1331 = vmatpush.msra.mxu0 %v1883_v22  ;;  %1260 = vmatpush.msra.mxu1 %v1879_v33  ;;  %v1850_v22 = vld [vmem:[%s3087_s14 + $0x110] sm:$0xff] }
 0x6fe   : > { %v872_v45 = vmul.f32 1.0614054, %v2051_v43  ;;  %v2053_v11 = vpop.eup %2052 }
 0x6ff   : > { %v897_v17 = vmul.f32 %v2053_v11, %v887_v7  ;;  %v2055_v20 = vpop.eup %2054  ;;  %1332 = vmatpush.msra.mxu0 %v1881_v24  ;;  %1261 = vmatpush.msra.mxu1 %v1878_v44  ;;  %v1854_v7 = vld [vmem:[%s3087_s14 + $0x130] sm:$0xff]  ;;  %v1849_v24 = vld [vmem:[%s3087_s14 + $0x108] sm:$0xff]  ;;  %v1932_v44 = vld [vmem:[%s3084_s11 + $0xd8] sm:$0xff] }
 0x700   : > { %v874_v47 = vadd.f32 -1.4531521, %v872_v45 }
 0x701   : > { %v899_v21 = vsub.f32 1.0, %v897_v17 }
 0x702   : > { %v876_v49 = vmul.f32 %v2051_v43, %v874_v47  ;;  %v1877_v47 = vld [vmem:[%s3087_s14 + $0x1e8] sm:$0xff] }
 0x703   : > { %v903_v25 = vsub.f32 0.0, %v899_v21  ;;  %1262 = vmatpush.msra.mxu1 %v1877_v47 }
 0x704   : > { %1847 = vmatmul.msk.f32.vlgmr.msrb.gmra.mxu1 %vm525_vm1, %v2471_v53  ;;  %v878_v52 = vadd.f32 1.4214138, %v876_v49  ;;  %v1894_v49 = vld [vmem:[%s3086_s13 + $0x58] sm:$0xff] }
 0x705   : > { %v905_v27 = vsel %vm901_vm2, %v899_v21, %v903_v25  ;;  %1263 = vmatpush.msra.mxu1 %v1876_v54  ;;  %v1866_v25 = vld [vmem:[%s3087_s14 + $0x190] sm:$0xff] }
 0x706   : > { %v880_v57 = vmul.f32 %v2051_v43, %v878_v52  ;;  %v907_v31 = vadd.f32 1.0, %v905_v27  ;;  %v1859_v52 = vld [vmem:[%s3087_s14 + $0x158] sm:$0xff]  ;;  %v1865_v27 = vld [vmem:[%s3087_s14 + $0x188] sm:$0xff] }
 0x708   : > { %v882_v63 = vadd.f32 -0.28449672, %v880_v57  ;;  %v909_v36 = vmul.f32 %v907_v31, %v859_v30  ;;  %v1875_v57 = vld [vmem:[%s3087_s14 + $0x1d8] sm:$0xff] }
 0x709   : > { %1264 = vmatpush.msra.mxu1 %v1875_v57 }
 0x70a   : > { %v884_v6 = vmul.f32 %v2051_v43, %v882_v63  ;;  %v1856_v63 = vld [vmem:[%s3087_s14 + $0x140] sm:$0xff] }
 0x70b   : > { %1265 = vmatpush.msra.mxu1 %v1874_v60 }
 0x70c   : > { %v886_v13 = vadd.f32 0.2548296, %v884_v6 }
 0x70d   : > { %1266 = vmatpush.msra.mxu1 %v1873_v0 }
 0x70e   : > { %v888_v19 = vmul.f32 %v2051_v43, %v886_v13  ;;  %v1861_v43 = vld [vmem:[%s3087_s14 + $0x168] sm:$0xff] }
 0x70f   : > { %1242 = vmatpush.msrb.mxu2 %v1861_v43  ;;  %1267 = vmatpush.msra.mxu1 %v1872_v4  ;;  %v1929_v43 = vld [vmem:[%s3084_s11 + $0xc0] sm:$0xff] }
 0x710   : > { %v898_v23 = vmul.f32 %v2055_v20, %v888_v19  ;;  %v1851_v19 = vld [vmem:[%s3087_s14 + $0x118] sm:$0xff]  ;;  %v1868_v20 = vld [vmem:[%s3087_s14 + $0x1a0] sm:$0xff] }
 0x711   : > { %1243 = vmatpush.msrb.mxu2 %v1860_v46  ;;  %1268 = vmatpush.msra.mxu1 %v1871_v8 }
 0x712   : > { %v900_v26 = vsub.f32 1.0, %v898_v23  ;;  %v1867_v23 = vld [vmem:[%s3087_s14 + $0x198] sm:$0xff] }
 0x713   : > { %1244 = vmatpush.msrb.mxu2 %v1859_v52  ;;  %1269 = vmatpush.msra.mxu1 %v1870_v12 }
 0x714   : > { %v904_v28 = vsub.f32 0.0, %v900_v26 }
 0x715   : > { %1245 = vmatpush.msrb.mxu2 %v1858_v56  ;;  %1270 = vmatpush.msra.mxu1 %v1869_v16 }
 0x716   : > { %v906_v34 = vsel %vm902_vm3, %v900_v26, %v904_v28  ;;  %v1848_v26 = vld [vmem:[%s3087_s14 + $0x100] sm:$0xff] }
 0x717   : > { %v908_v38 = vadd.f32 1.0, %v906_v34  ;;  %1246 = vmatpush.msrb.mxu2 %v1857_v59  ;;  %1271 = vmatpush.msra.mxu1 %v1868_v20  ;;  %v1935_v34 = vld [vmem:[%s3084_s11 + $0xf0] sm:$0xff] }
 0x719   : > { %v910_v35 = vmul.f32 %v908_v38, %v860_v37  ;;  %1247 = vmatpush.msrb.mxu2 %v1856_v63  ;;  %1272 = vmatpush.msra.mxu1 %v1867_v23 }
 0x71b   : > { %1248 = vmatpush.msrb.mxu2 %v1855_v3  ;;  %1273 = vmatpush.msra.mxu1 %v1866_v25  ;;  %v2080_v25 = vld [vmem:[%s2306_s16] sm:$0xff] }
 0x71d   : > { %1249 = vmatpush.msrb.mxu2 %v1854_v7  ;;  %1274 = vmatpush.msra.mxu1 %v1865_v27  ;;  %v1928_v27 = vld [vmem:[%s3087_s14 + $0x2f8] sm:$0xff] }
 0x769   : > { %v935_v39 = vpop.f32.mrf.mxu1 }
 0x76a   : > { %v958_v41 = vmul.f32 %v935_v39, %v909_v36  ;;  %v1864_v36 = vld [vmem:[%s3087_s14 + $0x180] sm:$0xff] }
 0x76b   : > { %1275 = vmatpush.msra.mxu1 %v1864_v36 }
 0x76c   : > { %1008 = vmatmul.f32.vlgmr.msrb.gmra.mxu3 %v958_v41  ;;  %v1936_v41 = vld [vmem:[%s3084_s11 + $0xf8] sm:$0xff] }
 0x76d   : > { %1408 = vmatpush.msrb.mxu3 %v1893_v32  ;;  %v1931_v32 = vld [vmem:[%s3084_s11 + $0xd0] sm:$0xff]  ;;  %1558 = vmatpush.msrb.mxu1 %v1936_v41  ;;  %v1908_v41 = vld [vmem:[%s3087_s14 + $0x258] sm:$0xff] }
 0x76f   : > { %v955_v45 = vpop.f32.mrf.mxu2  ;;  %1409 = vmatpush.msrb.mxu3 %v1891_v42 }
 0x770   : > { %v959_v48 = vmul.f32 %v955_v45, %v910_v35  ;;  %v1934_v35 = vld [vmem:[%s3084_s11 + $0xe8] sm:$0xff] }
 0x771   : > { %v2653_v50 = vpop.f32.mrf.mxu1  ;;  %1559 = vmatpush.msrb.mxu1 %v1934_v35 }
 0x772   : > { %1028 = vmatmul.f32.vlgmr.msrb.gmra.mxu0 %v959_v48 }
 0x773   : > { %1428 = vmatpush.msrb.mxu0 %v1894_v49  ;;  %1560 = vmatpush.msrb.mxu1 %v1932_v44  ;;  %v1922_v44 = vld [vmem:[%s3087_s14 + $0x2c8] sm:$0xff] }
 0x774   : > { %1889 = vmatmul.msk.f32.vlgmr.msra.gmra.mxu3 %vm501_vm0, %v2309_v9 }
 0x775   : > { %1429 = vmatpush.msrb.mxu0 %v1892_v55  ;;  %1561 = vmatpush.msrb.mxu1 %v1930_v51 }
 0x777   : > { %v1085_v62 = vpop.f32.mrf.mxu2 }
 0x778   : > { %v2687_v1 = vadd.f32 %v1085_v62, %v1064_v58 }
 0x779   : > { %v1105_v2 = vpop.f32.mrf.mxu1 }
 0x77a   : > { %v2696_v5 = vmul.f32 0.70710677, %v2687_v1  ;;  %v2698_v6 = vadd.f32 %v1105_v2, %v1065_v61  ;;  %1890 = vmatmul.msk.f32.vlgmr.msra.gmra.mxu0 %vm501_vm0, %v2309_v9  ;;  %v1853_v9 = vld [vmem:[%s3087_s14 + $0x128] sm:$0xff] }
 0x77b   : > { %1250 = vmatpush.msrb.mxu2 %v1853_v9  ;;  %1489 = vmatpush.msra.mxu0 %v1928_v27 }
 0x77c   : > { %v1112_v10 = vand.u32 2147483647, %v2696_v5  ;;  %v2710_v11 = vmul.f32 0.70710677, %v2698_v6  ;;  %1895 = vmatmul.msk.f32.vlgmr.msrb.gmra.mxu3 %vm525_vm1, %v2471_v53  ;;  %vm1150_vm4 = vcmp.ge.f32.partialorder %v2696_v5, 0.0  ;;  %v1942_v5 = vld [vmem:[%s3086_s13 + $0x70] sm:$0xff] }
 0x77d   : > { %1251 = vmatpush.msrb.mxu2 %v1852_v15 }
 0x77e   : > { %v1114_v13 = vmul.f32 0.3275911, %v1112_v10  ;;  %v1113_v14 = vand.u32 2147483647, %v2710_v11  ;;  %v1138_v30 = vsub.f32 0.0, %v1112_v10  ;;  %vm1151_vm5 = vcmp.ge.f32.partialorder %v2710_v11, 0.0 }
 0x77f   : > { %1252 = vmatpush.msrb.mxu2 %v1851_v19  ;;  %v1182_v19 = vpop.f32.mrf.mxu2 }
 0x780   : > { %v1116_v17 = vadd.f32 1.0, %v1114_v13  ;;  %v1115_v18 = vmul.f32 0.3275911, %v1113_v14  ;;  %v1139_v38 = vsub.f32 0.0, %v1113_v14  ;;  %v1140_v29 = vmul.f32 %v1138_v30, %v1112_v10  ;;  %v1927_v30 = vld [vmem:[%s3087_s14 + $0x2f0] sm:$0xff] }
 0x781   : > { %1253 = vmatpush.msrb.mxu2 %v1850_v22  ;;  %v1108_v13 = vmul.f32 0.5, %v2687_v1  ;;  %v1202_v23 = vpop.f32.mrf.mxu1  ;;  %v1940_v1 = vld [vmem:[%s3086_s13 + $0x60] sm:$0xff]  ;;  %1490 = vmatpush.msra.mxu0 %v1927_v30 }
 0x782   : > { %2056 = vrcp.f32 %v1116_v17  ;;  %v1117_v21 = vadd.f32 1.0, %v1115_v18  ;;  %1896 = vmatmul.msk.f32.vlgmr.msrb.gmra.mxu0 %vm525_vm1, %v2471_v53  ;;  %v1141_v46 = vmul.f32 %v1139_v38, %v1113_v14  ;;  %v1142_v48 = vmul.f32 1.442695, %v1140_v29  ;;  %v1925_v38 = vld [vmem:[%s3087_s14 + $0x2e0] sm:$0xff]  ;;  %v1907_v29 = vld [vmem:[%s3087_s14 + $0x250] sm:$0xff] }
 0x783   : > { %1254 = vmatpush.msrb.mxu2 %v1849_v24  ;;  %v1109_v18 = vmul.f32 0.5, %v2698_v6  ;;  %v1943_v6 = vld [vmem:[%s3086_s13 + $0x78] sm:$0xff]  ;;  %v1941_v24 = vld [vmem:[%s3086_s13 + $0x68] sm:$0xff] }
 0x784   : > { %2058 = vrcp.f32 %v1117_v21  ;;  %v1144_v55 = vmul.f32 1.442695, %v1141_v46 }
 0x785   : > { %1255 = vmatpush.msrb.mxu2 %v1848_v26  ;;  %2060 = vpow2.f32 %v1142_v48  ;;  %v1912_v26 = vld [vmem:[%s3087_s14 + $0x278] sm:$0xff]  ;;  %v1921_v48 = vld [vmem:[%s3087_s14 + $0x2c0] sm:$0xff] }
 0x786   : > { %2062 = vpow2.f32 %v1144_v55  ;;  %1469 = vmatpush.msra.mxu3 %v1912_v26 }
 0x787   : > { %1538 = vmatpush.msra.mxu2 %v1935_v34 }
 0x788   : > { %v2057_v28 = vpop.eup %2056 }
 0x789   : > { %v1120_v31 = vmul.f32 1.0614054, %v2057_v28  ;;  %1539 = vmatpush.msra.mxu2 %v1933_v40  ;;  %v1888_v40 = vld [vmem:[%s3085_s12 + $0x4] sm:$0x3] }
 0x78a   : > { %v2059_v37 = vpop.eup %2058  ;;  %v1293_v35 = vperm.slane %v1888_v40, 0 }
 0x78b   : > { %v1122_v39 = vadd.f32 -1.4531521, %v1120_v31  ;;  %v1121_v33 = vmul.f32 1.0614054, %v2059_v37  ;;  %1540 = vmatpush.msra.mxu2 %v1931_v32  ;;  %v2061_v63 = vpop.eup %2060  ;;  %v1926_v31 = vld [vmem:[%s3087_s14 + $0x2e8] sm:$0xff]  ;;  %v1924_v32 = vld [vmem:[%s3087_s14 + $0x2d8] sm:$0xff] }
 0x78c   : > { %v2063_v4 = vpop.eup %2062  ;;  %1491 = vmatpush.msra.mxu0 %v1926_v31 }
 0x78d   : > { %v1124_v42 = vmul.f32 %v2057_v28, %v1122_v39  ;;  %v1123_v45 = vadd.f32 -1.4531521, %v1121_v33  ;;  %1541 = vmatpush.msra.mxu2 %v1929_v43  ;;  %v1923_v33 = vld [vmem:[%s3087_s14 + $0x2d0] sm:$0xff]  ;;  %v1906_v43 = vld [vmem:[%s3087_s14 + $0x248] sm:$0xff] }
 0x78e   : > { %1492 = vmatpush.msra.mxu0 %v1925_v38 }
 0x78f   : > { %v1126_v47 = vadd.f32 1.4214138, %v1124_v42  ;;  %v1125_v49 = vmul.f32 %v2059_v37, %v1123_v45  ;;  %v1294_v42 = vperm.slane %v1888_v40, 1 }
 0x790   : > { %1493 = vmatpush.msra.mxu0 %v1924_v32 }
 0x791   : > { %v1128_v52 = vmul.f32 %v2057_v28, %v1126_v47  ;;  %v1127_v54 = vadd.f32 1.4214138, %v1125_v49  ;;  %v1905_v47 = vld [vmem:[%s3087_s14 + $0x240] sm:$0xff] }
 0x792   : > { %1494 = vmatpush.msra.mxu0 %v1923_v33 }
 0x793   : > { %v1130_v56 = vadd.f32 -0.28449672, %v1128_v52  ;;  %v1129_v57 = vmul.f32 %v2059_v37, %v1127_v54  ;;  %v1904_v52 = vld [vmem:[%s3087_s14 + $0x238] sm:$0xff] }
 0x794   : > { %1495 = vmatpush.msra.mxu0 %v1922_v44  ;;  %v1920_v54 = vld [vmem:[%s3087_s14 + $0x2b8] sm:$0xff] }
 0x795   : > { %v1132_v58 = vmul.f32 %v2057_v28, %v1130_v56  ;;  %v1131_v59 = vadd.f32 -0.28449672, %v1129_v57  ;;  %v1903_v57 = vld [vmem:[%s3087_s14 + $0x230] sm:$0xff] }
 0x796   : > { %1496 = vmatpush.msra.mxu0 %v1921_v48 }
 0x797   : > { %v1134_v60 = vadd.f32 0.2548296, %v1132_v58  ;;  %v1133_v61 = vmul.f32 %v2059_v37, %v1131_v59  ;;  %v1919_v58 = vld [vmem:[%s3087_s14 + $0x2b0] sm:$0xff] }
 0x798   : > { %1497 = vmatpush.msra.mxu0 %v1920_v54  ;;  %v1977_v54 = vld [vmem:[%s3087_s14 + $0x3f8] sm:$0xff] }
 0x799   : > { %v1136_v62 = vmul.f32 %v2057_v28, %v1134_v60  ;;  %v1135_v0 = vadd.f32 0.2548296, %v1133_v61  ;;  %v1911_v28 = vld [vmem:[%s3087_s14 + $0x270] sm:$0xff]  ;;  %v1902_v61 = vld [vmem:[%s3087_s14 + $0x228] sm:$0xff] }
 0x79a   : > { %1470 = vmatpush.msra.mxu3 %v1911_v28  ;;  %1498 = vmatpush.msra.mxu0 %v1919_v58 }
 0x79b   : > { %v1146_v2 = vmul.f32 %v2061_v63, %v1136_v62  ;;  %v1137_v3 = vmul.f32 %v2059_v37, %v1135_v0  ;;  %v1909_v37 = vld [vmem:[%s3087_s14 + $0x260] sm:$0xff]  ;;  %v1918_v62 = vld [vmem:[%s3087_s14 + $0x2a8] sm:$0xff] }
 0x79c   : > { %1499 = vmatpush.msra.mxu0 %v1918_v62 }
 0x79d   : > { %v1148_v7 = vsub.f32 1.0, %v1146_v2  ;;  %v1147_v8 = vmul.f32 %v2063_v4, %v1137_v3  ;;  %v1901_v2 = vld [vmem:[%s3087_s14 + $0x220] sm:$0xff] }
 0x79e   : > { %v1917_v3 = vld [vmem:[%s3087_s14 + $0x2a0] sm:$0xff] }
 0x79f   : > { %v1152_v10 = vsub.f32 0.0, %v1148_v7  ;;  %v1149_v9 = vsub.f32 1.0, %v1147_v8  ;;  %1500 = vmatpush.msra.mxu0 %v1917_v3  ;;  %v1900_v8 = vld [vmem:[%s3087_s14 + $0x218] sm:$0xff]  ;;  %v1974_v3 = vld [vmem:[%s3087_s14 + $0x3e0] sm:$0xff] }
 0x7a1   : > { %v1154_v12 = vsel %vm1150_vm4, %v1148_v7, %v1152_v10  ;;  %v1153_v15 = vsub.f32 0.0, %v1149_v9  ;;  %v1916_v10 = vld [vmem:[%s3087_s14 + $0x298] sm:$0xff] }
 0x7a2   : > { %v1156_v14 = vadd.f32 1.0, %v1154_v12  ;;  %1501 = vmatpush.msra.mxu0 %v1916_v10  ;;  %v1915_v12 = vld [vmem:[%s3087_s14 + $0x290] sm:$0xff]  ;;  %v1937_v10 = vld [vmem:[%s3085_s12 + $0x6] sm:$0x3] }
 0x7a3   : > { %v1155_v17 = vsel %vm1151_vm5, %v1149_v9, %v1153_v15  ;;  %v1899_v9 = vld [vmem:[%s3087_s14 + $0x210] sm:$0xff] }
 0x7a4   : > { %v1158_v16 = vmul.f32 %v1156_v14, %v1108_v13  ;;  %v1157_v20 = vadd.f32 1.0, %v1155_v17  ;;  %1502 = vmatpush.msra.mxu0 %v1915_v12  ;;  %v1898_v13 = vld [vmem:[%s3087_s14 + $0x208] sm:$0xff]  ;;  %v1897_v17 = vld [vmem:[%s3087_s14 + $0x200] sm:$0xff] }
 0x7a5   : > { %v1914_v14 = vld [vmem:[%s3087_s14 + $0x288] sm:$0xff]  ;;  %v1958_v12 = vld [vmem:[%s3087_s14 + $0x360] sm:$0xff] }
 0x7a6   : > { %v1205_v21 = vmul.f32 %v1182_v19, %v1158_v16  ;;  %v1159_v22 = vmul.f32 %v1157_v20, %v1109_v18  ;;  %1503 = vmatpush.msra.mxu0 %v1914_v14  ;;  %v1913_v18 = vld [vmem:[%s3087_s14 + $0x280] sm:$0xff] }
 0x7a8   : > { %1256 = vmatmul.f32.vlgmr.msrb.gmra.mxu2 %v1205_v21  ;;  %v1206_v11 = vmul.f32 %v1202_v23, %v1159_v22  ;;  %1504 = vmatpush.msra.mxu0 %v1913_v18  ;;  %v1971_v18 = vld [vmem:[%s3087_s14 + $0x3c8] sm:$0xff] }
 0x7a9   : > { %1637 = vmatpush.msrb.mxu2 %v1942_v5 }
 0x7aa   : > { %1276 = vmatmul.f32.vlgmr.msra.gmra.mxu1 %v1206_v11 }
 0x7ab   : > { %1638 = vmatpush.msrb.mxu2 %v1940_v1  ;;  %1657 = vmatpush.msra.mxu1 %v1943_v6 }
 0x7ad   : > { %1658 = vmatpush.msra.mxu1 %v1941_v24 }
 0x7b0   : > { %1938 = vmatmul.msk.f32.vlgmr.msra.gmra.mxu2 %vm501_vm0, %v2080_v25 }
 0x7b2   : > { %1939 = vmatmul.msk.f32.vlgmr.msrb.gmra.mxu1 %vm501_vm0, %v2080_v25 }
 0x7b3   : > { %1718 = vmatpush.msrb.mxu1 %v1977_v54 }
 0x7b8   : > { %1944 = vmatmul.msk.f32.vlgmr.msrb.gmra.mxu2 %vm525_vm1, %v2471_v53 }
 0x7ba   : > { %1945 = vmatmul.msk.f32.vlgmr.msra.gmra.mxu1 %vm525_vm1, %v2471_v53  ;;  %v1910_v53 = vld [vmem:[%s3087_s14 + $0x268] sm:$0xff] }
 0x7bb   : > { %1471 = vmatpush.msra.mxu3 %v1910_v53 }
 0x7bd   : > { %1472 = vmatpush.msra.mxu3 %v1909_v37 }
 0x7bf   : > { %1473 = vmatpush.msra.mxu3 %v1908_v41 }
 0x7c1   : > { %1474 = vmatpush.msra.mxu3 %v1907_v29 }
 0x7c3   : > { %1475 = vmatpush.msra.mxu3 %v1906_v43 }
 0x7c5   : > { %1476 = vmatpush.msra.mxu3 %v1905_v47 }
 0x7c7   : > { %1477 = vmatpush.msra.mxu3 %v1904_v52 }
 0x7c9   : > { %1478 = vmatpush.msra.mxu3 %v1903_v57 }
 0x7cb   : > { %1479 = vmatpush.msra.mxu3 %v1902_v61  ;;  %v1975_v61 = vld [vmem:[%s3087_s14 + $0x3e8] sm:$0xff] }
 0x7cd   : > { %1480 = vmatpush.msra.mxu3 %v1901_v2  ;;  %v1960_v2 = vld [vmem:[%s3087_s14 + $0x370] sm:$0xff] }
 0x7cf   : > { %1481 = vmatpush.msra.mxu3 %v1900_v8  ;;  %v1973_v8 = vld [vmem:[%s3087_s14 + $0x3d8] sm:$0xff] }
 0x7d1   : > { %1482 = vmatpush.msra.mxu3 %v1899_v9 }
 0x7d3   : > { %1483 = vmatpush.msra.mxu3 %v1898_v13  ;;  %v1972_v13 = vld [vmem:[%s3087_s14 + $0x3d0] sm:$0xff] }
 0x7d5   : > { %1484 = vmatpush.msra.mxu3 %v1897_v17  ;;  %v1957_v17 = vld [vmem:[%s3087_s14 + $0x358] sm:$0xff] }
 0x7ef   : > { %v1009_v34 = vpop.f32.mrf.mxu3  ;;  %v1029_v36 = vpop.f32.mrf.mxu0 }
 0x7f0   : > { %v2827_v39 = vadd.f32 %v1029_v36, %v1009_v34 }
 0x7f2   : > { %v1050_v14 = vadd.f32 %v2653_v50, %v2827_v39  ;;  %v1956_v50 = vld [vmem:[%s3087_s14 + $0x350] sm:$0xff]  ;;  %v1970_v39 = vld [vmem:[%s3087_s14 + $0x3c0] sm:$0xff] }
 0x7f7   : > { %v1314_v45 = vpop.f32.mrf.mxu3  ;;  %v1334_v46 = vpop.f32.mrf.mxu0 }
 0x7f8   : > { %v2856_v49 = vadd.f32 %v1314_v45, %v1293_v35  ;;  %v2858_v51 = vadd.f32 %v1334_v46, %v1294_v42 }
 0x7fa   : > { %v2867_v55 = vmul.f32 0.70710677, %v2856_v49  ;;  %v2870_v56 = vmul.f32 0.70710677, %v2858_v51  ;;  %v1337_v46 = vmul.f32 0.5, %v2856_v49  ;;  %v1338_v48 = vmul.f32 0.5, %v2858_v51 }
 0x7fb   : > { %v1961_v51 = vld [vmem:[%s3087_s14 + $0x378] sm:$0xff] }
 0x7fc   : > { %v1341_v59 = vand.u32 2147483647, %v2867_v55  ;;  %v1342_v60 = vand.u32 2147483647, %v2870_v56  ;;  %vm1379_vm1 = vcmp.ge.f32.partialorder %v2867_v55, 0.0  ;;  %vm1380_vm6 = vcmp.ge.f32.partialorder %v2870_v56, 0.0  ;;  %1698 = vmatpush.msra.mxu2 %v1961_v51 }
 0x7fd   : > { %v1976_v55 = vld [vmem:[%s3087_s14 + $0x3f0] sm:$0xff] }
 0x7fe   : > { %v1343_v63 = vmul.f32 0.3275911, %v1341_v59  ;;  %v1344_v0 = vmul.f32 0.3275911, %v1342_v60  ;;  %v1367_v15 = vsub.f32 0.0, %v1341_v59  ;;  %v1368_v16 = vsub.f32 0.0, %v1342_v60  ;;  %1719 = vmatpush.msrb.mxu1 %v1976_v55  ;;  %1699 = vmatpush.msra.mxu2 %v1960_v2 }
 0x800   : > { %v1345_v4 = vadd.f32 1.0, %v1343_v63  ;;  %v1346_v7 = vadd.f32 1.0, %v1344_v0  ;;  %v1369_v5 = vmul.f32 %v1367_v15, %v1341_v59  ;;  %v1370_v23 = vmul.f32 %v1368_v16, %v1342_v60  ;;  %v1411_v60 = vpop.f32.mrf.mxu3  ;;  %v1431_v63 = vpop.f32.mrf.mxu0  ;;  %1720 = vmatpush.msrb.mxu1 %v1975_v61 }
 0x801   : > { %v1523_v16 = vperm.slane %v1937_v10, 1 }
 0x802   : > { %2064 = vrcp.f32 %v1345_v4  ;;  %v1371_v24 = vmul.f32 1.442695, %v1369_v5  ;;  %v1373_v26 = vmul.f32 1.442695, %v1370_v23  ;;  %1721 = vmatpush.msrb.mxu1 %v1974_v3  ;;  %v1969_v23 = vld [vmem:[%s3087_s14 + $0x3b8] sm:$0xff] }
 0x803   : > { %2066 = vrcp.f32 %v1346_v7  ;;  %v1959_v7 = vld [vmem:[%s3087_s14 + $0x368] sm:$0xff] }
 0x804   : > { %2068 = vpow2.f32 %v1371_v24  ;;  %1700 = vmatpush.msra.mxu2 %v1959_v7  ;;  %1722 = vmatpush.msrb.mxu1 %v1973_v8  ;;  %v1968_v24 = vld [vmem:[%s3087_s14 + $0x3b0] sm:$0xff] }
 0x805   : > { %2070 = vpow2.f32 %v1373_v26 }
 0x806   : > { %1701 = vmatpush.msra.mxu2 %v1958_v12  ;;  %1723 = vmatpush.msrb.mxu1 %v1972_v13 }
 0x808   : > { %v2065_v19 = vpop.eup %2064  ;;  %1702 = vmatpush.msra.mxu2 %v1957_v17  ;;  %1724 = vmatpush.msrb.mxu1 %v1971_v18 }
 0x809   : > { %v2067_v20 = vpop.eup %2066  ;;  %v1349_v21 = vmul.f32 1.0614054, %v2065_v19 }
 0x80a   : > { %v1350_v22 = vmul.f32 1.0614054, %v2067_v20  ;;  %v2069_v40 = vpop.eup %2068  ;;  %1703 = vmatpush.msra.mxu2 %v1956_v50  ;;  %1725 = vmatpush.msrb.mxu1 %v1970_v39 }
 0x80b   : > { %v1351_v1 = vadd.f32 -1.4531521, %v1349_v21  ;;  %v2071_v32 = vpop.eup %2070  ;;  %v1522_v21 = vperm.slane %v1937_v10, 0 }
 0x80c   : > { %v1352_v11 = vadd.f32 -1.4531521, %v1350_v22  ;;  %v1955_v22 = vld [vmem:[%s3087_s14 + $0x348] sm:$0xff]  ;;  %1726 = vmatpush.msrb.mxu1 %v1969_v23 }
 0x80d   : > { %v1353_v6 = vmul.f32 %v2065_v19, %v1351_v1  ;;  %1704 = vmatpush.msra.mxu2 %v1955_v22 }
 0x80e   : > { %v1354_v25 = vmul.f32 %v2067_v20, %v1352_v11  ;;  %1727 = vmatpush.msrb.mxu1 %v1968_v24 }
 0x80f   : > { %v1355_v27 = vadd.f32 1.4214138, %v1353_v6  ;;  %v1954_v6 = vld [vmem:[%s3087_s14 + $0x340] sm:$0xff] }
 0x810   : > { %v1356_v28 = vadd.f32 1.4214138, %v1354_v25  ;;  %1705 = vmatpush.msra.mxu2 %v1954_v6 }
 0x811   : > { %v1357_v30 = vmul.f32 %v2065_v19, %v1355_v27  ;;  %v1953_v27 = vld [vmem:[%s3087_s14 + $0x338] sm:$0xff] }
 0x812   : > { %v1358_v53 = vmul.f32 %v2067_v20, %v1356_v28  ;;  %v1967_v28 = vld [vmem:[%s3087_s14 + $0x3a8] sm:$0xff]  ;;  %1706 = vmatpush.msra.mxu2 %v1953_v27 }
 0x813   : > { %v1359_v31 = vadd.f32 -0.28449672, %v1357_v30  ;;  %1728 = vmatpush.msrb.mxu1 %v1967_v28 }
 0x814   : > { %v1360_v34 = vadd.f32 -0.28449672, %v1358_v53 }
 0x815   : > { %v1361_v36 = vmul.f32 %v2065_v19, %v1359_v31  ;;  %v1952_v31 = vld [vmem:[%s3087_s14 + $0x330] sm:$0xff] }
 0x816   : > { %v1362_v37 = vmul.f32 %v2067_v20, %v1360_v34  ;;  %v1966_v34 = vld [vmem:[%s3087_s14 + $0x3a0] sm:$0xff]  ;;  %1707 = vmatpush.msra.mxu2 %v1952_v31 }
 0x817   : > { %v1363_v38 = vadd.f32 0.2548296, %v1361_v36  ;;  %1729 = vmatpush.msrb.mxu1 %v1966_v34 }
 0x818   : > { %v1364_v41 = vadd.f32 0.2548296, %v1362_v37 }
 0x819   : > { %v1365_v29 = vmul.f32 %v2065_v19, %v1363_v38  ;;  %v1951_v38 = vld [vmem:[%s3087_s14 + $0x328] sm:$0xff] }
 0x81a   : > { %v1366_v33 = vmul.f32 %v2067_v20, %v1364_v41  ;;  %1708 = vmatpush.msra.mxu2 %v1951_v38 }
 0x81b   : > { %v1375_v35 = vmul.f32 %v2069_v40, %v1365_v29  ;;  %v1965_v40 = vld [vmem:[%s3087_s14 + $0x398] sm:$0xff]  ;;  %v1964_v29 = vld [vmem:[%s3087_s14 + $0x390] sm:$0xff] }
 0x81c   : > { %v1376_v42 = vmul.f32 %v2071_v32, %v1366_v33  ;;  %1730 = vmatpush.msrb.mxu1 %v1965_v40  ;;  %v1950_v32 = vld [vmem:[%s3087_s14 + $0x320] sm:$0xff] }
 0x81d   : > { %v1377_v43 = vsub.f32 1.0, %v1375_v35  ;;  %1709 = vmatpush.msra.mxu2 %v1950_v32  ;;  %v1949_v35 = vld [vmem:[%s3087_s14 + $0x318] sm:$0xff] }
 0x81e   : > { %v1378_v44 = vsub.f32 1.0, %v1376_v42  ;;  %1731 = vmatpush.msrb.mxu1 %v1964_v29  ;;  %v1963_v42 = vld [vmem:[%s3087_s14 + $0x388] sm:$0xff] }
 0x81f   : > { %v1381_v45 = vsub.f32 0.0, %v1377_v43  ;;  %1710 = vmatpush.msra.mxu2 %v1949_v35 }
 0x820   : > { %v1382_v47 = vsub.f32 0.0, %v1378_v44  ;;  %1732 = vmatpush.msrb.mxu1 %v1963_v42 }
 0x821   : > { %v1383_v52 = vsel %vm1379_vm1, %v1377_v43, %v1381_v45  ;;  %v1948_v43 = vld [vmem:[%s3087_s14 + $0x310] sm:$0xff] }
 0x822   : > { %v1385_v57 = vadd.f32 1.0, %v1383_v52  ;;  %v1384_v58 = vsel %vm1380_vm6, %v1378_v44, %v1382_v47  ;;  %v1962_v44 = vld [vmem:[%s3087_s14 + $0x380] sm:$0xff]  ;;  %1711 = vmatpush.msra.mxu2 %v1948_v43  ;;  %v1947_v47 = vld [vmem:[%s3087_s14 + $0x308] sm:$0xff] }
 0x823   : > { %v1386_v59 = vadd.f32 1.0, %v1384_v58  ;;  %1733 = vmatpush.msrb.mxu1 %v1962_v44  ;;  %v1946_v52 = vld [vmem:[%s3087_s14 + $0x300] sm:$0xff] }
 0x824   : > { %v1387_v56 = vmul.f32 %v1385_v57, %v1337_v46  ;;  %1712 = vmatpush.msra.mxu2 %v1947_v47 }
 0x825   : > { %v1388_v49 = vmul.f32 %v1386_v59, %v1338_v48 }
 0x826   : > { %v1434_v62 = vmul.f32 %v1411_v60, %v1387_v56  ;;  %1713 = vmatpush.msra.mxu2 %v1946_v52 }
 0x827   : > { %v1435_v0 = vmul.f32 %v1431_v63, %v1388_v49  ;;  %v1277_v4 = vpop.f32.mrf.mxu1 }
 0x828   : > { %1485 = vmatmul.f32.vlgmr.msra.gmra.mxu3 %v1434_v62 }
 0x829   : > { %1505 = vmatmul.f32.vlgmr.msra.gmra.mxu0 %v1435_v0 }
 0x82b   : > { %v1257_v9 = vpop.f32.mrf.mxu2 }
 0x82c   : > { %v1278_v15 = vadd.f32 %v1277_v4, %v1257_v9 }
 0x82e   : > { %v2961_v19 = vadd.f32 %v1278_v15, %v1050_v14 }
 0x82f   : > { %v1563_v20 = vpop.f32.mrf.mxu1 }
 0x830   : > { %v2969_v5 = vadd.f32 %v1563_v20, %v1523_v16 }
 0x832   : > { %v2978_v1 = vmul.f32 0.70710677, %v2969_v5  ;;  %v1567_v22 = vmul.f32 0.5, %v2969_v5 }
 0x833   : > { %v1543_v11 = vpop.f32.mrf.mxu2 }
 0x834   : > { %v2986_v25 = vadd.f32 %v1543_v11, %v1522_v21  ;;  %v1571_v26 = vand.u32 2147483647, %v2978_v1  ;;  %vm1609_vm7 = vcmp.ge.f32.partialorder %v2978_v1, 0.0 }
 0x836   : > { %v2996_v30 = vmul.f32 0.70710677, %v2986_v25  ;;  %v1573_v53 = vmul.f32 0.3275911, %v1571_v26  ;;  %v1597_v46 = vsub.f32 0.0, %v1571_v26 }
 0x837   : > { %v1660_v27 = vpop.f32.mrf.mxu1 }
 0x838   : > { %v1570_v36 = vand.u32 2147483647, %v2996_v30  ;;  %v1575_v37 = vadd.f32 1.0, %v1573_v53  ;;  %v1599_v59 = vmul.f32 %v1597_v46, %v1571_v26  ;;  %vm1608_vm8 = vcmp.ge.f32.partialorder %v2996_v30, 0.0 }
 0x839   : > { %v1566_v26 = vmul.f32 0.5, %v2986_v25 }
 0x83a   : > { %v1572_v41 = vmul.f32 0.3275911, %v1570_v36  ;;  %2072 = vrcp.f32 %v1575_v37  ;;  %v1596_v57 = vsub.f32 0.0, %v1570_v36  ;;  %v1602_v61 = vmul.f32 1.442695, %v1599_v59 }
 0x83b   : > { %v1640_v34 = vpop.f32.mrf.mxu2 }
 0x83c   : > { %v1574_v33 = vadd.f32 1.0, %v1572_v41  ;;  %v1598_v49 = vmul.f32 %v1596_v57, %v1570_v36 }
 0x83e   : > { %2074 = vrcp.f32 %v1574_v33  ;;  %v1600_v2 = vmul.f32 1.442695, %v1598_v49 }
 0x83f   : > { %2076 = vpow2.f32 %v1602_v61 }
 0x840   : > { %v2073_v45 = vpop.eup %2072  ;;  %2078 = vpow2.f32 %v1600_v2 }
 0x841   : > { %v1579_v48 = vmul.f32 1.0614054, %v2073_v45 }
 0x843   : > { %v1581_v58 = vadd.f32 -1.4531521, %v1579_v48 }
 0x844   : > { %v2075_v54 = vpop.eup %2074 }
 0x845   : > { %v1578_v55 = vmul.f32 1.0614054, %v2075_v54  ;;  %v1583_v56 = vmul.f32 %v2073_v45, %v1581_v58  ;;  %v2077_v13 = vpop.eup %2076 }
 0x846   : > { %v2079_v17 = vpop.eup %2078 }
 0x847   : > { %v1580_v60 = vadd.f32 -1.4531521, %v1578_v55  ;;  %v1585_v51 = vadd.f32 1.4214138, %v1583_v56 }
 0x849   : > { %v1582_v62 = vmul.f32 %v2075_v54, %v1580_v60  ;;  %v1587_v63 = vmul.f32 %v2073_v45, %v1585_v51 }
 0x84b   : > { %v1584_v0 = vadd.f32 1.4214138, %v1582_v62  ;;  %v1589_v3 = vadd.f32 -0.28449672, %v1587_v63 }
 0x84d   : > { %v1586_v4 = vmul.f32 %v2075_v54, %v1584_v0  ;;  %v1591_v7 = vmul.f32 %v2073_v45, %v1589_v3 }
 0x84f   : > { %v1588_v8 = vadd.f32 -0.28449672, %v1586_v4  ;;  %v1593_v10 = vadd.f32 0.2548296, %v1591_v7 }
 0x851   : > { %v1590_v9 = vmul.f32 %v2075_v54, %v1588_v8  ;;  %v1595_v12 = vmul.f32 %v2073_v45, %v1593_v10 }
 0x853   : > { %v1592_v14 = vadd.f32 0.2548296, %v1590_v9  ;;  %v1605_v15 = vmul.f32 %v2077_v13, %v1595_v12 }
 0x855   : > { %v1594_v16 = vmul.f32 %v2075_v54, %v1592_v14  ;;  %v1607_v18 = vsub.f32 1.0, %v1605_v15 }
 0x857   : > { %v1604_v50 = vmul.f32 %v2079_v17, %v1594_v16  ;;  %v1611_v39 = vsub.f32 0.0, %v1607_v18 }
 0x859   : > { %v1606_v20 = vsub.f32 1.0, %v1604_v50  ;;  %v1613_v21 = vsel %vm1609_vm7, %v1607_v18, %v1611_v39 }
 0x85a   : > { %v1615_v23 = vadd.f32 1.0, %v1613_v21 }
 0x85b   : > { %v1610_v11 = vsub.f32 0.0, %v1606_v20 }
 0x85c   : > { %v1617_v6 = vmul.f32 %v1615_v23, %v1567_v22 }
 0x85d   : > { %v1612_v24 = vsel %vm1608_vm8, %v1606_v20, %v1610_v11 }
 0x85e   : > { %v1614_v28 = vadd.f32 1.0, %v1612_v24  ;;  %v1664_v53 = vmul.f32 %v1660_v27, %v1617_v6 }
 0x860   : > { %v1616_v31 = vmul.f32 %v1614_v28, %v1566_v26  ;;  %1734 = vmatmul.f32.vlgmr.msrb.gmra.mxu1 %v1664_v53 }
 0x862   : > { %v1663_v1 = vmul.f32 %v1640_v34, %v1616_v31 }
 0x864   : > { %1714 = vmatmul.f32.vlgmr.msra.gmra.mxu2 %v1663_v1 }
 0x8a6   : > { %v1506_v5 = vpop.f32.mrf.mxu0 }
 0x8ab   : > { %v1486_v36 = vpop.f32.mrf.mxu3 }
 0x8ac   : > { %v1507_v37 = vadd.f32 %v1506_v5, %v1486_v36 }
 0x8ae   : > { %v1509_v38 = vadd.f32 %v1507_v37, %v2961_v19 }
 0x8dd   : > { %v1735_v30 = vpop.f32.mrf.mxu1 }
 0x8e7   : > { %v1715_v25 = vpop.f32.mrf.mxu2 }
 0x8e8   : > { %v1736_v40 = vadd.f32 %v1735_v30, %v1715_v25 }
 0x8ea   : > { %v1738_v41 = vadd.f32 %v1736_v40, %v1509_v38 }
 0x8ec   : > { %1739 = vst.msk [vmem:[%s487_s17] sm:$0xff] %vm501_vm0, %v1738_v41 }
 0x8ed   : > { %2108 = shalt.err (!%p2105_p3)
}
 0x8ee   : > { %1982 = dma.vmem_to_hbm [thread:$0]  (%p2267_p5), %s1754_s18, 128, %s1756_s19, %s1741_s8  }
 0x8ef PF: > { %s3101_s28 = sld [smem:[#allocation6_spill]]  ;;  %p1988_p4 = scmp.ge.s32.totalorder %s2143_s23, 2 }
 0x8f1   : > { %p1985_p7 = pnand %p1988_p4, %p2271_p6 }
 0x8f3   : > { %p1986_p8 = pneg %p1985_p7 }
 0x8f5   : > { %s1767_s17 = sand.u32 1, %s3101_s28  }
 0x8f6   : > { %s1768_s22 = scalar_lea.sflag [#allocation4], %s1767_s17 }
 0x8f7   : > { %2126 = dma.done.wait (%p1986_p8), %s1768_s22, 128  }
 0x8f8   : > { %2128 = vsyncadd (%p1986_p8), %s1768_s22, 4294967168  ;;  %s3103_s23 = sld [smem:[#allocation8_spill]]  ;;  %s3106_s20 = smov %s2135_s21 }
 0x8f9   : > { %s3104_s24 = sld [smem:[#allocation7_spill]] }
 0x8fa   : > { %s3105_s22 = sld [smem:[#allocation9_spill]] }
 0x8fe   : > { %p27_p9 = scmp.ge.s32.totalorder %s3103_s23, 4  }
 0x8ff   : > { %s3107_s21 = smov %s3104_s24 }
 0x900   :  { %29 = sbr.rel (!%p27_p9) target bundleno = 6 (0x6), region = 127 }
 0x905   :  { %1774 = vsyncpa [#allocation4], 1 }
 0x906   :  { %1776 = vsyncpa [#allocation4 + $0x1], 1 }

</bundles_post_ra>
